<compile_context>
chip_gen: v7x
topology: tpu7x:2x2x1
jax: 0.10.0
libtpu: 0.0.40
codegen_flags: <defaults>
</compile_context>

<pallas_src>
import functools

import jax
import jax.numpy as jnp
from jax.experimental import pallas as pl
from jax.experimental.pallas import tpu as pltpu

EPS = 1e-5
LANE = 128


def _round_up(x, m):
    return (x + m - 1) // m * m


def _pick_row_tile(H, W, Kp, Cout, Cout_p):
    """Largest row-tile TH (divisor of H) whose per-tile VMEM stays in budget.

    The conv-output block's lane dim is TH*W, so TH*W must be a multiple of
    128 unless TH == H (a full-dim block is always legal)."""
    budget = 10 * 1024 * 1024                      # v7x-safe under a 32 MiB limit
    valid = [d for d in range(H, 0, -1)
             if H % d == 0 and (d == H or (d * W) % LANE == 0)]
    for d in valid:
        per_tile = d * W * (Kp * 2                 # bf16 im2col
                            + Cout_p * 4           # f32 accumulator (+ transpose)
                            + Cout * 2 * 2)        # double-buffered bf16 out block
        if per_tile <= budget:
            return d
    # TODO(synk): for very large images whose W never makes TH*W a multiple of
    # 128, add a column-tiled phase 1 instead of falling back like this.
    return valid[-1]


def _pick_hw_tile(HW, Cout, out_itemsize):
    """Biggest lane-dense spatial tile for phase 2 (mem-bound: bigger is better)."""
    budget = 8 * 1024 * 1024
    for t in (8192, 4096, 2048, 1024, 512, 256, 128):
        if HW % t == 0 and Cout * t * (2 + out_itemsize) * 2 <= budget:
            return t
    return HW


# --------------------------------------------------------------------------
# Phase 1: 3x3 conv (no bias; BN cancels it) + partial BN stats, one row tile
# --------------------------------------------------------------------------
def _conv_stats_kernel(x_ref, w_ref, conv_ref, stats_ref, *, TH, W, Cin, Cout, Kp):
    # x_ref    : (H+2, W+2, Cin)  bf16 halo-padded image (revisited across tiles)
    # w_ref    : (Kp, Cout_p)     bf16 im2col-flattened weight, K padded once
    # conv_ref : (Cout, TH*W)     bf16 conv output tile, channels-major (NCHW-ready)
    # stats_ref: (2, Cout_p)      f32 per-tile [sum ; sum-of-squares]
    t = pl.program_id(1)
    row0 = pl.multiple_of(t * TH, TH)
    xt = x_ref[pl.ds(row0, TH + 2), :, :]                       # (TH+2, W+2, Cin)

    M = TH * W
    cols = [xt[kh:kh + TH, kw:kw + W, :].reshape(M, Cin)
            for kh in range(3) for kw in range(3)]              # 9 x (M, Cin)
    pad = Kp - 9 * Cin
    if pad:
        cols.append(jnp.zeros((M, pad), dtype=xt.dtype))        # pad K once
    im2col = jnp.concatenate(cols, axis=1)                      # (M, Kp) bf16

    acc = jnp.dot(im2col, w_ref[...],
                  preferred_element_type=jnp.float32)           # (M, Cout_p) f32

    stats_ref[...] = jnp.concatenate(
        [jnp.sum(acc, axis=0, keepdims=True),
         jnp.sum(acc * acc, axis=0, keepdims=True)], axis=0)

    # Transpose in VMEM so the intermediate (and final output) is channels-major
    # and unpadded: lane-dense (Cout, TH*W) stores instead of 16x-padded rows.
    conv_ref[...] = acc.T[:Cout, :].astype(conv_ref.dtype)


# --------------------------------------------------------------------------
# Phase 2: fused BatchNorm affine + ReLU over lane-dense (Cout, T2) blocks
# --------------------------------------------------------------------------
def _bn_relu_kernel(conv_ref, scale_ref, shift_ref, o_ref):
    # conv_ref : (Cout, T2) bf16;  scale/shift: (Cout, 1) f32;  o_ref: (Cout, T2)
    y = conv_ref[...].astype(jnp.float32) * scale_ref[...] + shift_ref[...]
    o_ref[...] = jnp.maximum(y, 0.0).astype(o_ref.dtype)


@jax.jit
def conv_block(x_nchw, weight_oihw, bias, gamma, beta):
    """Pallas forward matching PyTorch ConvBlock(in_ch, out_ch)(x) (NCHW in/out)."""
    N, Cin, H, W = x_nchw.shape
    Cout = weight_oihw.shape[0]
    HW = H * W
    Cout_p = _round_up(Cout, LANE)
    K = 9 * Cin
    Kp = _round_up(K, LANE)

    # Layout glue: NCHW -> NHWC bf16 + 1-px halo.  NO channel padding in HBM.
    x_nhwc = jnp.transpose(x_nchw, (0, 2, 3, 1)).astype(jnp.bfloat16)
    x_pad = jnp.pad(x_nhwc, ((0, 0), (1, 1), (1, 1), (0, 0)))

    # Weight: OIHW -> (kh, kw, cin, cout) -> (9*Cin, Cout), pad K and Cout once.
    w_hwio = jnp.transpose(weight_oihw, (2, 3, 1, 0))
    w_flat = jnp.pad(w_hwio.reshape(K, Cout),
                     ((0, Kp - K), (0, Cout_p - Cout))).astype(jnp.bfloat16)

    TH = _pick_row_tile(H, W, Kp, Cout, Cout_p)
    nTH = H // TH

    conv_t, stats_nt = pl.pallas_call(
        functools.partial(_conv_stats_kernel, TH=TH, W=W, Cin=Cin, Cout=Cout, Kp=Kp),
        grid=(N, nTH),
        in_specs=[
            # Whole padded image per n; same block index across row tiles so it
            # is DMA'd once per image and re-used (rows sliced in-kernel).
            pl.BlockSpec((None, H + 2, W + 2, Cin), lambda n, t: (n, 0, 0, 0)),
            pl.BlockSpec((Kp, Cout_p), lambda n, t: (0, 0)),
        ],
        out_specs=[
            pl.BlockSpec((None, Cout, TH * W), lambda n, t: (n, 0, t)),
            pl.BlockSpec((None, 2, Cout_p), lambda n, t: (n * nTH + t, 0, 0)),
        ],
        out_shape=[
            jax.ShapeDtypeStruct((N, Cout, HW), jnp.bfloat16),       # bf16 intermediate
            jax.ShapeDtypeStruct((N * nTH, 2, Cout_p), jnp.float32),
        ],
        compiler_params=pltpu.CompilerParams(
            dimension_semantics=("parallel", "arbitrary"),
            vmem_limit_bytes=32 * 1024 * 1024),
    )(x_pad, w_flat)

    # Tiny cross-tile reduction + per-channel scale/shift precompute (f32).
    # Training-mode BN cancels the conv bias exactly (BN(conv+b) == BN(conv)),
    # so the bias is folded out here.
    stats = jnp.sum(stats_nt, axis=0)[:, :Cout]                      # (2, Cout)
    count = float(N * HW)
    mean = stats[0] / count
    var = stats[1] / count - mean * mean                              # biased var
    inv = jax.lax.rsqrt(var + EPS)
    scale = gamma.astype(jnp.float32) * inv
    shift = beta.astype(jnp.float32) - mean * scale
    del bias  # mathematically a no-op under training-mode BatchNorm
    scale2 = scale.reshape(Cout, 1)
    shift2 = shift.reshape(Cout, 1)

    T2 = _pick_hw_tile(HW, Cout, jnp.dtype(x_nchw.dtype).itemsize)
    nT2 = HW // T2

    out = pl.pallas_call(
        _bn_relu_kernel,
        grid=(N, nT2),
        in_specs=[
            pl.BlockSpec((None, Cout, T2), lambda n, t: (n, 0, t)),
            pl.BlockSpec((Cout, 1), lambda n, t: (0, 0)),
            pl.BlockSpec((Cout, 1), lambda n, t: (0, 0)),
        ],
        out_specs=pl.BlockSpec((None, Cout, T2), lambda n, t: (n, 0, t)),
        out_shape=jax.ShapeDtypeStruct((N, Cout, HW), x_nchw.dtype),
        compiler_params=pltpu.CompilerParams(
            dimension_semantics=("parallel", "parallel"),
            vmem_limit_bytes=32 * 1024 * 1024),
    )(conv_t, scale2, shift2)

    # Channels-major was produced inside the kernels -> NCHW is a free reshape.
    return out.reshape(N, Cout, H, W)


def reference(x_nchw, weight_oihw, bias, gamma, beta):
    """Pure-JAX (f32) reference of the PyTorch forward (training-mode BatchNorm)."""
    conv = jax.lax.conv_general_dilated(
        x_nchw, weight_oihw, window_strides=(1, 1), padding='SAME',
        dimension_numbers=('NCHW', 'OIHW', 'NCHW'))
    conv = conv + bias.reshape(1, -1, 1, 1)
    mean = conv.mean(axis=(0, 2, 3), keepdims=True)
    var = ((conv - mean) ** 2).mean(axis=(0, 2, 3), keepdims=True)
    y = (conv - mean) / jnp.sqrt(var + EPS)
    y = y * gamma.reshape(1, -1, 1, 1) + beta.reshape(1, -1, 1, 1)
    return jnp.maximum(y, 0.0)


if __name__ == "__main__":
    key = jax.random.PRNGKey(0)
    k_x, k_w, k_b, k_g, k_be = jax.random.split(key, 5)

    N, Cin, Cout, H, W = 2, 4, 8, 16, 16
    x = jax.random.normal(k_x, (N, Cin, H, W), jnp.float32)
    weight = 0.1 * jax.random.normal(k_w, (Cout, Cin, 3, 3), jnp.float32)
    bias = 0.1 * jax.random.normal(k_b, (Cout,), jnp.float32)
    gamma = 1.0 + 0.1 * jax.random.normal(k_g, (Cout,), jnp.float32)
    beta = 0.1 * jax.random.normal(k_be, (Cout,), jnp.float32)

    out = conv_block(x, weight, bias, gamma, beta)
    out = jax.block_until_ready(out)

    ref = reference(x, weight, bias, gamma, beta)
    assert out.shape == (N, Cout, H, W)
    # bf16 MXU inputs + bf16 intermediate vs an all-f32 reference.
    assert jnp.allclose(out, ref, atol=2e-2, rtol=2e-2), "mismatch vs reference"

    print("KERNEL_OK")
</pallas_src>

<mosaic_0001>
module attributes {stable_mosaic.version = 11 : i64} {
  func.func @_conv_stats_kernel(%arg0: i32, %arg1: i32, %arg2: memref<1x18x18x4xbf16, #tpu.memory_space<vmem>>, %arg3: memref<128x128xbf16, #tpu.memory_space<vmem>>, %arg4: memref<1x8x256xbf16, #tpu.memory_space<vmem>>, %arg5: memref<1x2x128xf32, #tpu.memory_space<vmem>>) attributes {dimension_semantics = [#tpu.dimension_semantics<parallel>, #tpu.dimension_semantics<arbitrary>], iteration_bounds = array<i64: 2, 1>, scalar_prefetch = 0 : i64, scratch_operands = 0 : i64, tpu.core_type = #tpu.core_type<tc>, window_params = [{transform_indices = @transform_0, window_bounds = array<i64: 1, 18, 18, 4>}, {pipeline_mode = #tpu.pipeline_mode<synchronous>, transform_indices = @transform_1, window_bounds = array<i64: 128, 128>}, {transform_indices = @transform_2, window_bounds = array<i64: 1, 8, 256>}, {transform_indices = @transform_3, window_bounds = array<i64: 1, 2, 128>}]} {
    %c16_i32 = arith.constant 16 : i32
    %0 = arith.muli %arg1, %c16_i32 : i32
    %1 = tpu.assume_multiple %0, 16 : i32
    %c0 = arith.constant 0 : index
    %2 = arith.index_cast %1 : i32 to index
    %c0_0 = arith.constant 0 : index
    %c0_1 = arith.constant 0 : index
    %3 = vector.load %arg2[%c0, %2, %c0_0, %c0_1] : memref<1x18x18x4xbf16, #tpu.memory_space<vmem>>, vector<1x18x18x4xbf16>
    %4 = vector.shape_cast %3 : vector<1x18x18x4xbf16> to vector<18x18x4xbf16>
    %5 = vector.extract_strided_slice %4 {offsets = [0, 0, 0], sizes = [16, 16, 4], strides = [1, 1, 1]} : vector<18x18x4xbf16> to vector<16x16x4xbf16>
    %6 = vector.shape_cast %5 : vector<16x16x4xbf16> to vector<256x4xbf16>
    %7 = vector.extract_strided_slice %4 {offsets = [0, 1, 0], sizes = [16, 16, 4], strides = [1, 1, 1]} : vector<18x18x4xbf16> to vector<16x16x4xbf16>
    %8 = vector.shape_cast %7 : vector<16x16x4xbf16> to vector<256x4xbf16>
    %9 = vector.extract_strided_slice %4 {offsets = [0, 2, 0], sizes = [16, 16, 4], strides = [1, 1, 1]} : vector<18x18x4xbf16> to vector<16x16x4xbf16>
    %10 = vector.shape_cast %9 : vector<16x16x4xbf16> to vector<256x4xbf16>
    %11 = vector.extract_strided_slice %4 {offsets = [1, 0, 0], sizes = [16, 16, 4], strides = [1, 1, 1]} : vector<18x18x4xbf16> to vector<16x16x4xbf16>
    %12 = vector.shape_cast %11 : vector<16x16x4xbf16> to vector<256x4xbf16>
    %13 = vector.extract_strided_slice %4 {offsets = [1, 1, 0], sizes = [16, 16, 4], strides = [1, 1, 1]} : vector<18x18x4xbf16> to vector<16x16x4xbf16>
    %14 = vector.shape_cast %13 : vector<16x16x4xbf16> to vector<256x4xbf16>
    %15 = vector.extract_strided_slice %4 {offsets = [1, 2, 0], sizes = [16, 16, 4], strides = [1, 1, 1]} : vector<18x18x4xbf16> to vector<16x16x4xbf16>
    %16 = vector.shape_cast %15 : vector<16x16x4xbf16> to vector<256x4xbf16>
    %17 = vector.extract_strided_slice %4 {offsets = [2, 0, 0], sizes = [16, 16, 4], strides = [1, 1, 1]} : vector<18x18x4xbf16> to vector<16x16x4xbf16>
    %18 = vector.shape_cast %17 : vector<16x16x4xbf16> to vector<256x4xbf16>
    %19 = vector.extract_strided_slice %4 {offsets = [2, 1, 0], sizes = [16, 16, 4], strides = [1, 1, 1]} : vector<18x18x4xbf16> to vector<16x16x4xbf16>
    %20 = vector.shape_cast %19 : vector<16x16x4xbf16> to vector<256x4xbf16>
    %21 = vector.extract_strided_slice %4 {offsets = [2, 2, 0], sizes = [16, 16, 4], strides = [1, 1, 1]} : vector<18x18x4xbf16> to vector<16x16x4xbf16>
    %22 = vector.shape_cast %21 : vector<16x16x4xbf16> to vector<256x4xbf16>
    %cst = arith.constant 0.000000e+00 : bf16
    %23 = vector.broadcast %cst : bf16 to vector<256x92xbf16>
    %24 = tpu.concatenate %6, %8, %10, %12, %14, %16, %18, %20, %22, %23 in 1 : vector<256x4xbf16>, vector<256x4xbf16>, vector<256x4xbf16>, vector<256x4xbf16>, vector<256x4xbf16>, vector<256x4xbf16>, vector<256x4xbf16>, vector<256x4xbf16>, vector<256x4xbf16>, vector<256x92xbf16> -> vector<256x128xbf16>
    %c0_2 = arith.constant 0 : index
    %c0_3 = arith.constant 0 : index
    %25 = vector.load %arg3[%c0_2, %c0_3] : memref<128x128xbf16, #tpu.memory_space<vmem>>, vector<128x128xbf16>
    %cst_4 = arith.constant dense<0.000000e+00> : vector<256x128xf32>
    %26 = tpu.matmul %24, %25, %cst_4 {dimension_numbers = #tpu.dot_dimension_numbers<[1], [0], [0], [1], [0, 0, 1, 1], [], []>} : vector<256x128xbf16>, vector<128x128xbf16>, vector<256x128xf32> -> vector<256x128xf32>
    %cst_5 = arith.constant dense<0.000000e+00> : vector<128xf32>
    %27 = vector.multi_reduction <add>, %26, %cst_5 [0] : vector<256x128xf32> to vector<128xf32>
    %28 = vector.shape_cast %27 : vector<128xf32> to vector<1x128xf32>
    %29 = arith.mulf %26, %26 : vector<256x128xf32>
    %cst_6 = arith.constant dense<0.000000e+00> : vector<128xf32>
    %30 = vector.multi_reduction <add>, %29, %cst_6 [0] : vector<256x128xf32> to vector<128xf32>
    %31 = vector.shape_cast %30 : vector<128xf32> to vector<1x128xf32>
    %32 = tpu.concatenate %28, %31 in 0 : vector<1x128xf32>, vector<1x128xf32> -> vector<2x128xf32>
    %c0_7 = arith.constant 0 : index
    %c0_8 = arith.constant 0 : index
    %c0_9 = arith.constant 0 : index
    %33 = vector.load %arg5[%c0_7, %c0_8, %c0_9] : memref<1x2x128xf32, #tpu.memory_space<vmem>>, vector<1x2x128xf32>
    %34 = vector.shape_cast %33 : vector<1x2x128xf32> to vector<2x128xf32>
    %35 = vector.shape_cast %32 : vector<2x128xf32> to vector<1x2x128xf32>
    tpu.vector_store %arg5[%c0_7, %c0_8, %c0_9], %35 {strides = array<i32>} : memref<1x2x128xf32, #tpu.memory_space<vmem>>, vector<1x2x128xf32>,
    %36 = tpu.transpose %26, [1, 0] : vector<256x128xf32> -> vector<128x256xf32>
    %37 = vector.extract_strided_slice %36 {offsets = [0, 0], sizes = [8, 256], strides = [1, 1]} : vector<128x256xf32> to vector<8x256xf32>
    %38 = arith.truncf %37 : vector<8x256xf32> to vector<8x256xbf16>
    %c0_10 = arith.constant 0 : index
    %c0_11 = arith.constant 0 : index
    %c0_12 = arith.constant 0 : index
    %39 = vector.load %arg4[%c0_10, %c0_11, %c0_12] : memref<1x8x256xbf16, #tpu.memory_space<vmem>>, vector<1x8x256xbf16>
    %40 = vector.shape_cast %39 : vector<1x8x256xbf16> to vector<8x256xbf16>
    %41 = vector.shape_cast %38 : vector<8x256xbf16> to vector<1x8x256xbf16>
    tpu.vector_store %arg4[%c0_10, %c0_11, %c0_12], %41 {strides = array<i32>} : memref<1x8x256xbf16, #tpu.memory_space<vmem>>, vector<1x8x256xbf16>,
    return
  }
  func.func @transform_0(%arg0: i32, %arg1: i32) -> (i32, i32, i32, i32) {
    %c0_i32 = arith.constant 0 : i32
    %c0_i32_0 = arith.constant 0 : i32
    %c0_i32_1 = arith.constant 0 : i32
    %c0_i32_2 = arith.constant 0 : i32
    return %arg0, %c0_i32, %c0_i32_0, %c0_i32_1 : i32, i32, i32, i32
  }
  func.func @transform_1(%arg0: i32, %arg1: i32) -> (i32, i32) {
    %c0_i32 = arith.constant 0 : i32
    %c0_i32_0 = arith.constant 0 : i32
    %c0_i32_1 = arith.constant 0 : i32
    return %c0_i32, %c0_i32_0 : i32, i32
  }
  func.func @transform_2(%arg0: i32, %arg1: i32) -> (i32, i32, i32) {
    %c0_i32 = arith.constant 0 : i32
    %c0_i32_0 = arith.constant 0 : i32
    return %arg0, %c0_i32, %arg1 : i32, i32, i32
  }
  func.func @transform_3(%arg0: i32, %arg1: i32) -> (i32, i32, i32) {
    %c1_i32 = arith.constant 1 : i32
    %0 = arith.muli %arg0, %c1_i32 : i32
    %1 = arith.addi %0, %arg1 : i32
    %c0_i32 = arith.constant 0 : i32
    %c0_i32_0 = arith.constant 0 : i32
    %c0_i32_1 = arith.constant 0 : i32
    return %1, %c0_i32, %c0_i32_0 : i32, i32, i32
  }
}

module attributes {stable_mosaic.version = 11 : i64} {
  func.func @_bn_relu_kernel(%arg0: i32, %arg1: i32, %arg2: memref<1x8x256xbf16, #tpu.memory_space<vmem>>, %arg3: memref<8x1xf32, #tpu.memory_space<vmem>>, %arg4: memref<8x1xf32, #tpu.memory_space<vmem>>, %arg5: memref<1x8x256xf32, #tpu.memory_space<vmem>>) attributes {dimension_semantics = [#tpu.dimension_semantics<parallel>, #tpu.dimension_semantics<parallel>], iteration_bounds = array<i64: 2, 1>, scalar_prefetch = 0 : i64, scratch_operands = 0 : i64, tpu.core_type = #tpu.core_type<tc>, window_params = [{transform_indices = @transform_0, window_bounds = array<i64: 1, 8, 256>}, {pipeline_mode = #tpu.pipeline_mode<synchronous>, transform_indices = @transform_1, window_bounds = array<i64: 8, 1>}, {pipeline_mode = #tpu.pipeline_mode<synchronous>, transform_indices = @transform_2, window_bounds = array<i64: 8, 1>}, {transform_indices = @transform_3, window_bounds = array<i64: 1, 8, 256>}]} {
    %c0 = arith.constant 0 : index
    %c0_0 = arith.constant 0 : index
    %c0_1 = arith.constant 0 : index
    %0 = vector.load %arg2[%c0, %c0_0, %c0_1] : memref<1x8x256xbf16, #tpu.memory_space<vmem>>, vector<1x8x256xbf16>
    %1 = vector.shape_cast %0 : vector<1x8x256xbf16> to vector<8x256xbf16>
    %2 = arith.extf %1 : vector<8x256xbf16> to vector<8x256xf32>
    %c0_2 = arith.constant 0 : index
    %c0_3 = arith.constant 0 : index
    %3 = vector.load %arg3[%c0_2, %c0_3] : memref<8x1xf32, #tpu.memory_space<vmem>>, vector<8x1xf32>
    %4 = vector.broadcast %3 : vector<8x1xf32> to vector<8x256xf32>
    %5 = arith.mulf %2, %4 : vector<8x256xf32>
    %c0_4 = arith.constant 0 : index
    %c0_5 = arith.constant 0 : index
    %6 = vector.load %arg4[%c0_4, %c0_5] : memref<8x1xf32, #tpu.memory_space<vmem>>, vector<8x1xf32>
    %7 = vector.broadcast %6 : vector<8x1xf32> to vector<8x256xf32>
    %8 = arith.addf %5, %7 : vector<8x256xf32>
    %cst = arith.constant 0.000000e+00 : f32
    %9 = vector.broadcast %cst : f32 to vector<8x256xf32>
    %10 = arith.maximumf %8, %9 : vector<8x256xf32>
    %c0_6 = arith.constant 0 : index
    %c0_7 = arith.constant 0 : index
    %c0_8 = arith.constant 0 : index
    %11 = vector.load %arg5[%c0_6, %c0_7, %c0_8] : memref<1x8x256xf32, #tpu.memory_space<vmem>>, vector<1x8x256xf32>
    %12 = vector.shape_cast %11 : vector<1x8x256xf32> to vector<8x256xf32>
    %13 = vector.shape_cast %10 : vector<8x256xf32> to vector<1x8x256xf32>
    tpu.vector_store %arg5[%c0_6, %c0_7, %c0_8], %13 {strides = array<i32>} : memref<1x8x256xf32, #tpu.memory_space<vmem>>, vector<1x8x256xf32>,
    return
  }
  func.func @transform_0(%arg0: i32, %arg1: i32) -> (i32, i32, i32) {
    %c0_i32 = arith.constant 0 : i32
    %c0_i32_0 = arith.constant 0 : i32
    return %arg0, %c0_i32, %arg1 : i32, i32, i32
  }
  func.func @transform_1(%arg0: i32, %arg1: i32) -> (i32, i32) {
    %c0_i32 = arith.constant 0 : i32
    %c0_i32_0 = arith.constant 0 : i32
    %c0_i32_1 = arith.constant 0 : i32
    return %c0_i32, %c0_i32_0 : i32, i32
  }
  func.func @transform_2(%arg0: i32, %arg1: i32) -> (i32, i32) {
    %c0_i32 = arith.constant 0 : i32
    %c0_i32_0 = arith.constant 0 : i32
    %c0_i32_1 = arith.constant 0 : i32
    return %c0_i32, %c0_i32_0 : i32, i32
  }
  func.func @transform_3(%arg0: i32, %arg1: i32) -> (i32, i32, i32) {
    %c0_i32 = arith.constant 0 : i32
    %c0_i32_0 = arith.constant 0 : i32
    return %arg0, %c0_i32, %arg1 : i32, i32, i32
  }
}

</mosaic_0001>

<bundles_post_ra>
// kernel: conv_block.3
= control target key start
LH: loop header
LB: loop body
LE: loop exit
PB: predicated region body
PF: predicated region fallthrough
CT: control target
= control target key end

     0   :  { %s404_s12 = smov 0   ;;  %s406_s13 = smov 0   ;;  %s443_s0 = inlined_call_operand.vmem [shape: bf16[2,8,256], index: 0, kind: input, shape index: {}]   ;;  %s444_s1 = inlined_call_operand.vmem [shape: f32[8,1], index: 1, kind: input, shape index: {}]   ;;  %s445_s2 = inlined_call_operand.vmem [shape: f32[8,1], index: 2, kind: input, shape index: {}]   ;;  %s446_s3 = inlined_call_operand.vmem [shape: f32[2,8,256], index: 3, kind: output, shape index: {}]  }
   0x1   :  { %s408_s14 = smov 0  }
   0x2 LB: > { %s25_s15 = sadd.s32 1, %s377_s13  ;;  %p324_p0 = scmp.ge.s32.totalorder %s381_s14, 1  ;;  %s381_s14 = sphi %s408_s14, %s13_s14   ;;  %s377_s13 = sphi %s406_s13, %s448_s13   ;;  %s373_s12 = sphi %s404_s12, %s447_s12  }
   0x3   : > { %p27_p1 = scmp.ge.s32.totalorder %s25_s15, 2  ;;  %p158_p2 = scmp.lt.s32.totalorder %s381_s14, 3 }
   0x5   : > { %s450_s15 = smov (%p27_p1, %s25_s15), 0  ;;  %p159_p3 = pnand %p324_p0, %p158_p2 }
   0x6   : > { %v213_v0 = vld [vmem:[%s444_s1] sm:$0xff] (!%p159_p3)  ;;  %v383_v1 = vmov (!%p159_p3), 0   ;;  %p191_p4 = scmp.lt.s32.totalorder (!%p159_p3), %s373_s12, 1 }
   0x7   : > { %162 = sbr.rel (%p159_p3) target bundleno = 145 (0x91), region = 32  ;;  %358 = vset.pattern.permute.xlu0 (!%p159_p3), %v383_v1  ;;  %v221_v2 = vld [vmem:[%s445_s2] sm:$0xff] (!%p159_p3) }
   0x8   : > { %216 = vperm.xlu0 (!%p159_p3), %358, %v213_v0  }
   0xc   : > { %224 = vperm.xlu0 (!%p159_p3), %358, %v221_v2  }
   0xe   : > { %s452_s12 = smov (!%p191_p4, %s373_s12), 1 }
   0xf   : > { %s331_s20 = sshll.u32 %s452_s12, 3  ;;  %s332_s24 = sshll.u32 %s452_s12, 4 }
  0x10   : > { %s198_s23 = scalar_lea.vmem %s443_s0, %s331_s20  ;;  %s208_s27 = scalar_lea.vmem %s446_s3, %s332_s24 }
  0x11   : > { %v210_v3 = vld [vmem:[%s198_s23] sm:$0xff] }
  0x12   : > { %v211_v4 = vunpack.c.l.bf16 %v210_v3  ;;  %v212_v5 = vunpack.c.h.bf16 %v210_v3 }
  0x87   : > { %v217_v6 = vpop.permute.xlu0 %216 }
  0x88   : > { %v219_v7 = vmul.f32 %v217_v6, %v211_v4  ;;  %v220_v8 = vmul.f32 %v217_v6, %v212_v5 }
  0x8b   : > { %v225_v9 = vpop.permute.xlu0 %224 }
  0x8c   : > { %v227_v10 = vadd.f32 %v225_v9, %v219_v7  ;;  %v228_v11 = vadd.f32 %v225_v9, %v220_v8 }
  0x8e   : > { %v229_v12 = vmax.f32 %v227_v10, 0.0  ;;  %v230_v13 = vmax.f32 %v228_v11, 0.0 }
  0x90   : > { %231 = vst [vmem:[%s208_s27] sm:$0xff] %v229_v12  ;;  %232 = vst [vmem:[%s208_s27 + $0x8] sm:$0xff] %v230_v13 }
  0x91 PF: > { %s13_s14 = sadd.s32 1, %s381_s14   ;;  %s447_s12 = smov %s377_s13 }
  0x92   : > { %p10_p5 = scmp.ge.s32.totalorder %s13_s14, 4   ;;  %s448_s13 = smov %s450_s15 }
  0x94   :  { %12 = sbr.rel (!%p10_p5) target bundleno = 2 (0x2), region = 62 }

// kernel: conv_block.2
= control target key start
LH: loop header
LB: loop body
LE: loop exit
PB: predicated region body
PF: predicated region fallthrough
CT: control target
= control target key end

     0   :  { %s2489_s12 = smov 0   ;;  %s2491_s13 = smov 0   ;;  %s3638_s0 = inlined_call_operand.vmem [shape: bf16[2,18,18,4], index: 0, kind: input, shape index: {}]   ;;  %s3639_s1 = inlined_call_operand.vmem [shape: bf16[128,128], index: 1, kind: input, shape index: {}]   ;;  %s3640_s2 = inlined_call_operand.vmem [shape: bf16[2,8,256], index: 2, kind: output, shape index: {0}]   ;;  %s3641_s3 = inlined_call_operand.vmem [shape: f32[2,2,128], index: 3, kind: output, shape index: {1}]  }
   0x1   :  { %s2493_s14 = smov 0  }
   0x2 LB: > { %s26_s15 = sadd.s32 1, %s2455_s13  ;;  %p2147_p0 = scmp.ge.s32.totalorder %s2459_s14, 1  ;;  %s2459_s14 = sphi %s2493_s14, %s14_s14   ;;  %s2455_s13 = sphi %s2491_s13, %s3647_s13   ;;  %s2451_s12 = sphi %s2489_s12, %s3646_s12  }
   0x3   : > { %p28_p1 = scmp.ge.s32.totalorder %s26_s15, 2  ;;  %p156_p2 = scmp.lt.s32.totalorder %s2459_s14, 3 }
   0x5   : > { %s3649_s15 = smov (%p28_p1, %s26_s15), 0  ;;  %p157_p3 = pnand %p2147_p0, %p156_p2 }
   0x6   : > { %p189_p4 = scmp.lt.s32.totalorder (!%p157_p3), %s2451_s12, 1  ;;  %v2420_v0 = vld [vmem:[%s3639_s1] sm:$0xff] (!%p157_p3)   ;;  %vm704_vm0 = vcmask (!%p157_p3), 1042432   ;;  %vm705_vm1 = vcmask (!%p157_p3), 1046532   ;;  %v2421_v1 = vld [vmem:[%s3639_s1 + $0x8] sm:$0xff] (!%p157_p3)   ;;  %s2461_s24 = smov (!%p157_p3), 12  }
   0x7   : > { %160 = sbr.rel (%p157_p3) target bundleno = 698 (0x2ba), region = 28  ;;  %2277 = vmatprep.subr.bf16.mxu0 (!%p157_p3), %v2420_v0  ;;  %2325 = vmatprep.subr.bf16.mxu1 (!%p157_p3), %v2420_v0  ;;  %vm269_vm2 = vsmask.f32 (!%p157_p3), 3328  ;;  %vm270_vm3 = vsmask.f32 (!%p157_p3), 7440  ;;  %vm2548_vm4 = vmor (!%p157_p3), %vm704_vm0, %vm705_vm1  ;;  %v2423_v29 = vld [vmem:[%s3639_s1 + $0x10] sm:$0xff] (!%p157_p3)  }
   0x8   : > { %2278 = vmatpush3.bf16.msra.mxu0 (!%p157_p3), %v2420_v0  ;;  %2333 = vmatpush3.bf16.msra.mxu1 (!%p157_p3), %v2420_v0  ;;  %s2462_s27 = smov (!%p157_p3), 20   ;;  %v2424_v51 = vld [vmem:[%s3639_s1 + $0x18] sm:$0xff] (!%p157_p3)   ;;  %vm2596_vm5 = vmor (!%p157_p3), %vm269_vm2, %vm270_vm3  ;;  %s2463_s30 = smov (!%p157_p3), 8   ;;  %vm1305_vm6 = vcmask (!%p157_p3), 31744   ;;  %vm1354_vm7 = vcmask (!%p157_p3), 64512   ;;  %vm1387_vm8 = vcmask (!%p157_p3), 97280  }
   0x9   : > { %2279 = vmatprep.subr.bf16.mxu0 (!%p157_p3), %v2421_v1  ;;  %2326 = vmatprep.subr.bf16.mxu1 (!%p157_p3), %v2421_v1  ;;  %s2464_s4 = smov (!%p157_p3), 4   ;;  %s2465_s11 = smov (!%p157_p3), 16   ;;  %vm1420_vm9 = vcmask (!%p157_p3), 130048   ;;  %vm1453_vm10 = vcmask (!%p157_p3), 162816   ;;  %vm1486_vm11 = vcmask (!%p157_p3), 195584   ;;  %vm1519_vm12 = vcmask (!%p157_p3), 228352  }
   0xa   : > { %s2467_s19 = smov (!%p157_p3), 28   ;;  %s2468_s20 = smov (!%p157_p3), 32   ;;  %vm1552_vm13 = vcmask (!%p157_p3), 261120   ;;  %vm1585_vm14 = vcmask (!%p157_p3), 293888   ;;  %vm1950_vm15 = vcmask (!%p157_p3), 1040384  }
   0xc   : > { %2280 = vmatpush3.bf16.msra.mxu0 (!%p157_p3), %v2421_v1  ;;  %2334 = vmatpush3.bf16.msra.mxu1 (!%p157_p3), %v2421_v1 }
   0xd   : > { %2281 = vmatprep.subr.bf16.mxu0 (!%p157_p3), %v2423_v29  ;;  %2327 = vmatprep.subr.bf16.mxu1 (!%p157_p3), %v2423_v29 }
   0xe   : > { %s3651_s12 = smov (!%p189_p4, %s2451_s12), 1 }
   0xf   : > { %s2341_s18 = smul.u32 216, %s3651_s12  ;;  %s2251_s25 = sshll.u32 %s3651_s12, 3 }
  0x10   : > { %2282 = vmatpush3.bf16.msra.mxu0 %v2423_v29  ;;  %2335 = vmatpush3.bf16.msra.mxu1 %v2423_v29  ;;  %s202_s28 = scalar_lea.vmem %s3640_s2, %s2251_s25 }
  0x11   : > { %s2516_s21 = scalar_lea.vmem %s3638_s0, %s2341_s18  ;;  %2283 = vmatprep.subr.bf16.mxu0 %v2424_v51  ;;  %2328 = vmatprep.subr.bf16.mxu1 %v2424_v51  ;;  %s2466_s18 = smov 24  }
  0x12   : > { %v2522_v2 = vld [vmem:[%s2516_s21 + $0x18] sm:$0xf]  ;;  %v2525_v3 = vld [vmem:[%s2516_s21 + $0x1c] sm:$0xf]  ;;  %v218_v4 = vld [vmem:[%s2516_s21 + $0xc] sm:$0xf] }
  0x13   : > { %v334_v5 = vshrl.u32 %v2525_v3, 16  ;;  %v2531_v6 = vcombine.low %v2522_v2, %v2525_v3  ;;  %v321_v7 = vshrl.u32 %v2522_v2, 16  ;;  %v324_v8 = vshll.u32 %v2522_v2, 16  ;;  %v2536_v9 = vld [vmem:[%s2516_s21 + $0x10] sm:$0xf] }
  0x14   : > { %v306_v10 = vshll.u32 %v2536_v9, 16  ;;  %v310_v11 = vshrl.u32 %v2536_v9, 16  ;;  %v2541_v12 = vcombine.low %v218_v4, %v2536_v9  ;;  %v297_v13 = vshrl.u32 %v218_v4, 16  ;;  %v2544_v14 = vld [vmem:[%s2516_s21 + $0x14] sm:$0x1]  ;;  %2284 = vmatpush3.bf16.msra.mxu0 %v2424_v51  ;;  %2336 = vmatpush3.bf16.msra.mxu1 %v2424_v51 }
  0x15   : > { %1100 = vrot.lane.b32.xlu1 %v2531_v6, %s2461_s24  ;;  %v300_v16 = vshll.u32 %v218_v4, 16  ;;  %v2153_v17 = vrot.slane %v218_v4, 9  ;;  %v716_v18 = vrot.slane %v2536_v9, 5  ;;  %v719_v19 = vrot.slane %v2544_v14, 5  ;;  %v2557_v20 = vld [vmem:[%s2516_s21] sm:$0xf] }
  0x16   : > { %v2559_v21 = vrot.slane %v310_v11, 4  ;;  %1098 = vrot.lane.b32.xlu0 %v2541_v12, %s2461_s24  ;;  %v299_v22 = vrot.slane %v297_v13, 4  ;;  %v2564_v23 = vld [vmem:[%s2516_s21 + $0x4] sm:$0xf]  ;;  %v217_v24 = vld [vmem:[%s2516_s21 + $0x8] sm:$0x1] }
  0x17   : > { %v302_v25 = vrot.slane %v300_v16, 5  ;;  %v717_v26 = vsel %vm2548_vm4, %v2153_v17, %v716_v18  ;;  %v718_v27 = vrot.slane %v716_v18, 4  ;;  %v2152_v28 = vrot.slane %v2557_v20, 9  ;;  %v2581_v38 = vld [vmem:[%s2516_s21 + $0x20] sm:$0x1] }
  0x18   : > { %v709_v30 = vrot.slane %v2564_v23, 5  ;;  %v712_v31 = vrot.slane %v217_v24, 5  ;;  %v273_v32 = vshrl.u32 %v2557_v20, 16  ;;  %v276_v33 = vshll.u32 %v2557_v20, 16  ;;  %v2612_v11 = vld [vmem:[%s2516_s21 + $0x24] sm:$0xf] }
  0x19   : > { %v720_v34 = vsel %vm2548_vm4, %v718_v27, %v719_v19  ;;  %v282_v35 = vshll.u32 %v2564_v23, 16  ;;  %v286_v36 = vshrl.u32 %v2564_v23, 16  ;;  %v292_v37 = vshll.u32 %v217_v24, 16  ;;  %v2623_v17 = vld [vmem:[%s2516_s21 + $0x28] sm:$0xf] }
  0x1a   : > { %v2203_v39 = vcombine.low %v717_v26, %v720_v34  ;;  %v710_v40 = vsel %vm2548_vm4, %v2152_v28, %v709_v30  ;;  %v711_v41 = vrot.slane %v709_v30, 4  ;;  %v275_v42 = vrot.slane %v273_v32, 4  ;;  %v2637_v30 = vld [vmem:[%s2516_s21 + $0x2c] sm:$0x1] }
  0x1b   : > { %v278_v43 = vrot.slane %v276_v33, 5  ;;  %v284_v44 = vrot.slane %v282_v35, 5  ;;  %v288_v45 = vrot.slane %v286_v36, 4  ;;  %v294_v46 = vrot.slane %v292_v37, 5 }
  0x1c   : > { %1168 = vrot.lane.b32.xlu0 %v2203_v39, %s2462_s27  ;;  %v713_v47 = vsel %vm2548_vm4, %v711_v41, %v712_v31  ;;  %v2154_v48 = vrot.slane %v2522_v2, 9  ;;  %v723_v49 = vrot.slane %v2525_v3, 5  ;;  %v726_v50 = vrot.slane %v2581_v38, 5 }
  0x1d   : > { %v2202_v52 = vcombine.low %v710_v40, %v713_v47  ;;  %v279_v53 = vor.u32 %v278_v43, %v275_v42  ;;  %v289_v54 = vor.u32 %v288_v45, %v284_v44  ;;  %v303_v55 = vor.u32 %v302_v25, %v299_v22  ;;  %v2428_v42 = vld [vmem:[%s3639_s1 + $0x28] sm:$0xff]   ;;  %v2429_v43 = vld [vmem:[%s3639_s1 + $0x30] sm:$0xff]  }
  0x1e   : > { %v724_v57 = vsel %vm2548_vm4, %v2154_v48, %v723_v49  ;;  %v725_v58 = vrot.slane %v723_v49, 4  ;;  %v308_v59 = vrot.slane %v306_v10, 5  ;;  %v316_v60 = vshll.u32 %v2544_v14, 16 }
  0x1f   : > { %1063 = vrot.lane.b32.xlu1 %v2202_v52, %s2463_s30  ;;  %v280_v61 = vrot.slane %v279_v53, 4  ;;  %v290_v62 = vrot.slane %v289_v54, 4  ;;  %v304_v63 = vrot.slane %v303_v55, 4  ;;  %v323_v0 = vrot.slane %v321_v7, 4  ;;  %v2430_v52 = vld [vmem:[%s3639_s1 + $0x38] sm:$0xff]  }
  0x20   : > { %v727_v1 = vsel %vm2548_vm4, %v725_v58, %v726_v50  ;;  %v313_v4 = vor.u32 %v2559_v21, %v308_v59  ;;  %v318_v9 = vrot.slane %v316_v60, 5  ;;  %v326_v10 = vrot.slane %v324_v8, 5  ;;  %v2659_v50 = vld [vmem:[%s2516_s21 + $0x60] sm:$0xf]  ;;  %v2671_v54 = vld [vmem:[%s2516_s21 + $0x64] sm:$0xf] }
  0x21   : > { %v285_v13 = vsel %vm2596_vm5, %v280_v61, %v284_v44  ;;  %v295_v14 = vsel %vm2596_vm5, %v290_v62, %v294_v46  ;;  %v2618_v7 = vcombine.low %v724_v57, %v727_v1  ;;  %v309_v16 = vsel %vm2596_vm5, %v304_v63, %v308_v59  ;;  %v2679_v59 = vld [vmem:[%s2516_s21 + $0x30] sm:$0xf]  ;;  %v2686_v63 = vld [vmem:[%s2516_s21 + $0x34] sm:$0xf] }
  0x22   : > { %v2186_v18 = vcombine.low %v285_v13, %v295_v14  ;;  %v314_v2 = vrot.slane %v313_v4, 4  ;;  %v327_v8 = vor.u32 %v326_v10, %v323_v0  ;;  %v330_v19 = vshll.u32 %v2525_v3, 16  ;;  %v2426_v3 = vld [vmem:[%s3639_s1 + $0x20] sm:$0xff]  }
  0x23   : > { %1065 = vrot.lane.b32.xlu1 %v2203_v39, %s2463_s30  ;;  %v336_v21 = vrot.slane %v334_v5, 4  ;;  %v340_v22 = vshll.u32 %v2581_v38, 16  ;;  %v345_v24 = vshrl.u32 %v2612_v11, 16  ;;  %v348_v25 = vshll.u32 %v2612_v11, 16  ;;  %2285 = vmatprep.subr.bf16.mxu0 %v2426_v3 }
  0x24   : > { %983 = vrot.lane.b32.xlu0 %v2186_v18, %s2464_s4  ;;  %v319_v26 = vsel %vm2596_vm5, %v314_v2, %v318_v9  ;;  %v328_v27 = vrot.slane %v327_v8, 4  ;;  %v332_v28 = vrot.slane %v330_v19, 5  ;;  %v358_v29 = vshrl.u32 %v2623_v17, 16  ;;  %2329 = vmatprep.subr.bf16.mxu1 %v2426_v3  ;;  %v2704_v18 = vld [vmem:[%s2516_s21 + $0x68] sm:$0x1] }
  0x25   : > { %v2187_v5 = vcombine.low %v309_v16, %v319_v26  ;;  %v347_v31 = vrot.slane %v345_v24, 4  ;;  %v342_v33 = vrot.slane %v340_v22, 5  ;;  %v350_v34 = vrot.slane %v348_v25, 5  ;;  %2286 = vmatpush3.bf16.msra.mxu0 %v2426_v3  ;;  %2337 = vmatpush3.bf16.msra.mxu1 %v2426_v3  ;;  %v2710_v22 = vld [vmem:[%s2516_s21 + $0x6c] sm:$0xf] }
  0x26   : > { %v337_v32 = vor.u32 %v336_v21, %v332_v28  ;;  %v354_v35 = vshll.u32 %v2623_v17, 16  ;;  %v360_v36 = vrot.slane %v358_v29, 4  ;;  %v364_v37 = vshll.u32 %v2637_v30, 16  ;;  %2287 = vmatprep.subr.bf16.mxu0 %v2428_v42  ;;  %2330 = vmatprep.subr.bf16.mxu1 %v2428_v42  ;;  %v2713_v24 = vld [vmem:[%s2516_s21 + $0x70] sm:$0xf] }
  0x27   : > { %1170 = vrot.lane.b32.xlu1 %v2618_v7, %s2462_s27  ;;  %v333_v38 = vsel %vm2596_vm5, %v328_v27, %v332_v28  ;;  %v351_v40 = vor.u32 %v350_v34, %v347_v31  ;;  %v730_v49 = vrot.slane %v2623_v17, 5  ;;  %v2668_v53 = vcombine.low %v2612_v11, %v2623_v17  ;;  %v229_v31 = vld [vmem:[%s2516_s21 + $0x38] sm:$0x1] }
  0x28   : > { %985 = vrot.lane.b32.xlu0 %v2187_v5, %s2464_s4  ;;  %v338_v39 = vrot.slane %v337_v32, 4  ;;  %v356_v41 = vrot.slane %v354_v35, 5  ;;  %v366_v47 = vrot.slane %v364_v37, 5  ;;  %v2155_v58 = vrot.slane %v2612_v11, 9 }
  0x29   : > { %v352_v45 = vrot.slane %v351_v40, 4  ;;  %2288 = vmatpush3.bf16.msra.mxu0 %v2428_v42  ;;  %2338 = vmatpush3.bf16.msra.mxu1 %v2428_v42  ;;  %v732_v60 = vrot.slane %v730_v49, 4  ;;  %v733_v61 = vrot.slane %v2637_v30, 5  ;;  %v465_v62 = vshrl.u32 %v2659_v50, 16 }
  0x2a   : > { %v343_v44 = vsel %vm2596_vm5, %v338_v39, %v342_v33  ;;  %v361_v46 = vor.u32 %v360_v36, %v356_v41  ;;  %2289 = vmatprep.subr.bf16.mxu0 %v2429_v43  ;;  %2331 = vmatprep.subr.bf16.mxu1 %v2429_v43  ;;  %v468_v0 = vshll.u32 %v2659_v50, 16  ;;  %v474_v1 = vshll.u32 %v2671_v54, 16 }
  0x2b   : > { %v2188_v48 = vcombine.low %v333_v38, %v343_v44  ;;  %v357_v55 = vsel %vm2596_vm5, %v352_v45, %v356_v41  ;;  %v478_v4 = vshrl.u32 %v2671_v54, 16  ;;  %v731_v10 = vsel %vm2548_vm4, %v2155_v58, %v730_v49 }
  0x2c   : > { %1133 = vrot.lane.b32.xlu0 %v2187_v5, %s2465_s11  ;;  %v362_v51 = vrot.slane %v361_v46, 4  ;;  %v369_v11 = vshrl.u32 %v2679_v59, 16  ;;  %v734_v13 = vsel %vm2548_vm4, %v732_v60, %v733_v61  ;;  %v372_v14 = vshll.u32 %v2679_v59, 16  ;;  %v244_v46 = vld [vmem:[%s2516_s21 + $0x74] sm:$0x1] }
  0x2d   : > { %1135 = vrot.lane.b32.xlu1 %v2188_v48, %s2465_s11  ;;  %2290 = vmatpush3.bf16.msra.mxu0 %v2429_v43  ;;  %v382_v16 = vshrl.u32 %v2686_v63, 16  ;;  %v467_v17 = vrot.slane %v465_v62, 4  ;;  %v470_v2 = vrot.slane %v468_v0, 5  ;;  %v476_v8 = vrot.slane %v474_v1, 5 }
  0x2e   : > { %v367_v57 = vsel %vm2596_vm5, %v362_v51, %v366_v47  ;;  %2291 = vmatprep.subr.bf16.mxu0 %v2430_v52  ;;  %2339 = vmatpush3.bf16.msra.mxu1 %v2429_v43  ;;  %v480_v19 = vrot.slane %v478_v4, 4  ;;  %v378_v21 = vshll.u32 %v2686_v63, 16  ;;  %v2715_v25 = vcombine.low %v731_v10, %v734_v13 }
  0x2f   : > { %v2693_v9 = vcombine.low %v357_v55, %v367_v57  ;;  %2332 = vmatprep.subr.bf16.mxu1 %v2430_v52  ;;  %v484_v26 = vshll.u32 %v2704_v18, 16  ;;  %v371_v27 = vrot.slane %v369_v11, 4  ;;  %v374_v28 = vrot.slane %v372_v14, 5 }
  0x30   : > { %1203 = vrot.lane.b32.xlu0 %v2531_v6, %s2466_s18  ;;  %v471_v29 = vor.u32 %v470_v2, %v467_v17  ;;  %v481_v30 = vor.u32 %v480_v19, %v476_v8  ;;  %v380_v3 = vrot.slane %v378_v21, 5  ;;  %v384_v5 = vrot.slane %v382_v16, 4 }
  0x31   : > { %1205 = vrot.lane.b32.xlu1 %v2668_v53, %s2466_s18  ;;  %2292 = vmatpush3.bf16.msra.mxu0 %v2430_v52  ;;  %v489_v32 = vshrl.u32 %v2710_v22, 16  ;;  %v492_v33 = vshll.u32 %v2710_v22, 16  ;;  %v498_v34 = vshll.u32 %v2713_v24, 16  ;;  %v502_v35 = vshrl.u32 %v2713_v24, 16 }
  0x32   : > { %2340 = vmatpush3.bf16.msra.mxu1 %v2430_v52  ;;  %v486_v36 = vrot.slane %v484_v26, 5  ;;  %v375_v37 = vor.u32 %v374_v28, %v371_v27  ;;  %v472_v38 = vrot.slane %v471_v29, 4  ;;  %v482_v39 = vrot.slane %v481_v30, 4 }
  0x33   : > { %v385_v40 = vor.u32 %v384_v5, %v380_v3  ;;  %v388_v41 = vshll.u32 %v229_v31, 16  ;;  %v491_v42 = vrot.slane %v489_v32, 4  ;;  %v494_v43 = vrot.slane %v492_v33, 5 }
  0x34   : > { %1238 = vrot.lane.b32.xlu0 %v2188_v48, %s2467_s19  ;;  %v500_v44 = vrot.slane %v498_v34, 5  ;;  %v504_v45 = vrot.slane %v502_v35, 4  ;;  %v2733_v47 = vcombine.low %v2679_v59, %v2686_v63  ;;  %v477_v49 = vsel %vm2596_vm5, %v472_v38, %v476_v8  ;;  %v2800_v38 = vld [vmem:[%s2516_s21 + $0x7c] sm:$0xf] }
  0x35   : > { %1240 = vrot.lane.b32.xlu1 %v2693_v9, %s2467_s19  ;;  %v487_v51 = vsel %vm2596_vm5, %v482_v39, %v486_v36  ;;  %v376_v52 = vrot.slane %v375_v37, 4  ;;  %v390_v55 = vrot.slane %v388_v41, 5  ;;  %v386_v57 = vrot.slane %v385_v40, 4  ;;  %v2797_v37 = vld [vmem:[%s2516_s21 + $0x78] sm:$0xf] }
  0x36   : > { %v495_v58 = vor.u32 %v494_v43, %v491_v42  ;;  %v505_v60 = vor.u32 %v504_v45, %v500_v44  ;;  %v508_v61 = vshll.u32 %v244_v46, 16  ;;  %v2160_v62 = vrot.slane %v2659_v50, 9 }
  0x37   : > { %v2748_v1 = vcombine.low %v477_v49, %v487_v51  ;;  %v381_v4 = vsel %vm2596_vm5, %v376_v52, %v380_v3  ;;  %v737_v10 = vrot.slane %v2686_v63, 5  ;;  %v391_v11 = vsel %vm2596_vm5, %v386_v57, %v390_v55  ;;  %v232_v49 = vld [vmem:[%s2516_s21 + $0x44] sm:$0x1] }
  0x38   : > { %1273 = vrot.lane.b32.xlu0 %v2618_v7, %s2468_s20  ;;  %v496_v13 = vrot.slane %v495_v58, 4  ;;  %v506_v14 = vrot.slane %v505_v60, 4  ;;  %v510_v16 = vrot.slane %v508_v61, 5  ;;  %v2156_v2 = vrot.slane %v2679_v59, 9  ;;  %v2774_v59 = vld [vmem:[%s2516_s21 + $0x3c] sm:$0xf] }
  0x39   : > { %987 = vrot.lane.b32.xlu1 %v2188_v48, %s2464_s4  ;;  %v765_v48 = vrot.slane %v2671_v54, 5  ;;  %v2764_v63 = vcombine.low %v381_v4, %v391_v11  ;;  %v739_v8 = vrot.slane %v737_v10, 4  ;;  %v740_v19 = vrot.slane %v229_v31, 5 }
  0x3a   : > { %v772_v21 = vrot.slane %v2713_v24, 5  ;;  %v501_v26 = vsel %vm2596_vm5, %v496_v13, %v500_v44  ;;  %v511_v27 = vsel %vm2596_vm5, %v506_v14, %v510_v16  ;;  %v738_v29 = vsel %vm2548_vm4, %v2156_v2, %v737_v10  ;;  %v247_v10 = vld [vmem:[%s2516_s21 + $0x80] sm:$0x1] }
  0x3b   : > { %v767_v0 = vrot.slane %v765_v48, 4  ;;  %v766_v17 = vsel %vm2548_vm4, %v2160_v62, %v765_v48  ;;  %v2161_v30 = vrot.slane %v2710_v22, 9  ;;  %v2786_v3 = vcombine.low %v501_v26, %v511_v27 }
  0x3c   : > { %1275 = vrot.lane.b32.xlu0 %v2715_v25, %s2468_s20  ;;  %v741_v5 = vsel %vm2548_vm4, %v739_v8, %v740_v19  ;;  %v774_v31 = vrot.slane %v772_v21, 4  ;;  %v775_v32 = vrot.slane %v244_v46, 5  ;;  %v393_v33 = vshrl.u32 %v2774_v59, 16 }
  0x3d   : > { %989 = vrot.lane.b32.xlu1 %v2693_v9, %s2464_s4  ;;  %v396_v34 = vshll.u32 %v2774_v59, 16  ;;  %v2804_v39 = vcombine.low %v738_v29, %v741_v5  ;;  %v513_v45 = vshrl.u32 %v2797_v37, 16  ;;  %v516_v46 = vshll.u32 %v2797_v37, 16 }
  0x3e   : > { %v776_v40 = vsel %vm2548_vm4, %v774_v31, %v775_v32  ;;  %v395_v41 = vrot.slane %v393_v33, 4  ;;  %v526_v48 = vshrl.u32 %v2800_v38, 16  ;;  %v522_v51 = vshll.u32 %v2800_v38, 16 }
  0x3f   : > { %v398_v42 = vrot.slane %v396_v34, 5  ;;  %v2821_v52 = vcombine.low %v2710_v22, %v2713_v24  ;;  %v412_v60 = vshll.u32 %v232_v49, 16  ;;  %v2170_v61 = vcombine.low %v2557_v20, %v2564_v23 }
  0x40   : > { %1067 = vrot.lane.b32.xlu0 %v2618_v7, %s2463_s30  ;;  %v768_v7 = vrot.slane %v2704_v18, 5  ;;  %v515_v62 = vrot.slane %v513_v45, 4  ;;  %v528_v4 = vrot.slane %v526_v48, 4  ;;  %v2866_v33 = vcombine.low %v2659_v50, %v2671_v54  ;;  %v2906_v48 = vld [vmem:[%s2516_s21 + $0x4c] sm:$0xf] }
  0x41   : > { %1069 = vrot.lane.b32.xlu1 %v2715_v25, %s2463_s30  ;;  %v399_v57 = vor.u32 %v398_v42, %v395_v41  ;;  %v414_v13 = vrot.slane %v412_v60, 5  ;;  %v779_v34 = vrot.slane %v2800_v38, 5  ;;  %v2162_v50 = vrot.slane %v2797_v37, 9  ;;  %v2888_v41 = vld [vmem:[%s2516_s21 + $0x88] sm:$0xf] }
  0x42   : > { %v769_v18 = vsel %vm2548_vm4, %v767_v0, %v768_v7  ;;  %v518_v0 = vrot.slane %v516_v46, 5  ;;  %v524_v7 = vrot.slane %v522_v51, 5  ;;  %v546_v45 = vshll.u32 %v2888_v41, 16  ;;  %v2903_v46 = vld [vmem:[%s2516_s21 + $0x48] sm:$0xf] }
  0x43   : > { %v2779_v28 = vcombine.low %v766_v17, %v769_v18  ;;  %v400_v24 = vrot.slane %v399_v57, 4  ;;  %v532_v17 = vshll.u32 %v247_v10, 16  ;;  %v2842_v18 = vcombine.low %v2797_v37, %v2800_v38 }
  0x44   : > { %1102 = vrot.lane.b32.xlu0 %v2668_v53, %s2461_s24  ;;  %v519_v14 = vor.u32 %v518_v0, %v515_v62  ;;  %v529_v16 = vor.u32 %v528_v4, %v524_v7  ;;  %v782_v38 = vrot.slane %v247_v10, 5  ;;  %v417_v62 = vshrl.u32 %v2903_v46, 16  ;;  %v250_v4 = vld [vmem:[%s2516_s21 + $0x8c] sm:$0x1] }
  0x45   : > { %1104 = vrot.lane.b32.xlu1 %v2733_v47, %s2461_s24  ;;  %v534_v26 = vrot.slane %v532_v17, 5  ;;  %v420_v0 = vshll.u32 %v2903_v46, 16  ;;  %v426_v10 = vshll.u32 %v2906_v48, 16 }
  0x46   : > { %v520_v19 = vrot.slane %v519_v14, 4 }
  0x47   : > { %v422_v14 = vrot.slane %v420_v0, 5 }
  0x48   : > { %1137 = vrot.lane.b32.xlu0 %v2693_v9, %s2465_s11  ;;  %v2777_v9 = vld [vmem:[%s2516_s21 + $0x40] sm:$0xf]  ;;  %v525_v5 = vsel %vm2596_vm5, %v520_v19, %v524_v7  ;;  %v430_v7 = vshrl.u32 %v2906_v48, 16 }
  0x49   : > { %999 = vrot.lane.b32.xlu1 %v2748_v1, %s2464_s4  ;;  %v406_v35 = vshrl.u32 %v2777_v9, 16  ;;  %v402_v36 = vshll.u32 %v2777_v9, 16  ;;  %v2834_v22 = vcombine.low %v2774_v59, %v2777_v9  ;;  %v744_v27 = vrot.slane %v2777_v9, 5 }
  0x4a   : > { %v747_v9 = vrot.slane %v232_v49, 5  ;;  %v432_v17 = vrot.slane %v430_v7, 4 }
  0x4b   : > { %v404_v43 = vrot.slane %v402_v36, 5  ;;  %v408_v44 = vrot.slane %v406_v35, 4  ;;  %v746_v32 = vrot.slane %v744_v27, 4 }
  0x4c   : > { %1139 = vrot.lane.b32.xlu0 %v2764_v63, %s2465_s11 }
  0x4d   : > { %1172 = vrot.lane.b32.xlu1 %v2715_v25, %s2462_s27  ;;  %v773_v25 = vsel %vm2548_vm4, %v2161_v30, %v772_v21  ;;  %v409_v58 = vor.u32 %v408_v44, %v404_v43  ;;  %v405_v2 = vsel %vm2596_vm5, %v400_v24, %v404_v43  ;;  %v530_v21 = vrot.slane %v529_v16, 4 }
  0x4e   : > { %v2823_v55 = vcombine.low %v773_v25, %v776_v40  ;;  %v2157_v30 = vrot.slane %v2774_v59, 9  ;;  %v748_v36 = vsel %vm2548_vm4, %v746_v32, %v747_v9  ;;  %v781_v25 = vrot.slane %v779_v34, 4  ;;  %v2885_v40 = vld [vmem:[%s2516_s21 + $0x84] sm:$0xf] }
  0x4f   : > { %v410_v11 = vrot.slane %v409_v58, 4  ;;  %v535_v31 = vsel %vm2596_vm5, %v530_v21, %v534_v26  ;;  %v537_v37 = vshrl.u32 %v2885_v40, 16  ;;  %v540_v43 = vshll.u32 %v2885_v40, 16 }
  0x50   : > { %1001 = vrot.lane.b32.xlu0 %v2786_v3, %s2464_s4  ;;  %v2870_v59 = vcombine.low %v525_v5, %v535_v31  ;;  %v745_v35 = vsel %vm2548_vm4, %v2157_v30, %v744_v27  ;;  %v783_v42 = vsel %vm2548_vm4, %v781_v25, %v782_v38  ;;  %v550_v44 = vshrl.u32 %v2888_v41, 16 }
  0x51   : > { %1079 = vrot.lane.b32.xlu1 %v2779_v28, %s2463_s30  ;;  %v415_v8 = vsel %vm2596_vm5, %v410_v11, %v414_v13  ;;  %v2882_v54 = vcombine.low %v745_v35, %v748_v36  ;;  %v539_v51 = vrot.slane %v537_v37, 4  ;;  %v542_v57 = vrot.slane %v540_v43, 5 }
  0x52   : > { %v2853_v29 = vcombine.low %v405_v2, %v415_v8  ;;  %v548_v58 = vrot.slane %v546_v45, 5  ;;  %v552_v60 = vrot.slane %v550_v44, 4  ;;  %v556_v11 = vshll.u32 %v250_v4, 16  ;;  %v235_v2 = vld [vmem:[%s2516_s21 + $0x50] sm:$0x1] }
  0x53   : > { %v419_v13 = vrot.slane %v417_v62, 4  ;;  %v428_v16 = vrot.slane %v426_v10, 5  ;;  %v2928_v8 = vcombine.low %v2885_v40, %v2888_v41  ;;  %v436_v5 = vshll.u32 %v235_v2, 16  ;;  %v2980_v62 = vld [vmem:[%s2516_s21 + $0x58] sm:$0xf] }
  0x54   : > { %1174 = vrot.lane.b32.xlu0 %v2804_v39, %s2462_s27  ;;  %v553_v24 = vor.u32 %v552_v60, %v548_v58  ;;  %v558_v26 = vrot.slane %v556_v11, 5  ;;  %v2936_v31 = vcombine.low %v2903_v46, %v2906_v48  ;;  %v2163_v38 = vrot.slane %v2885_v40, 9 }
  0x55   : > { %1207 = vrot.lane.b32.xlu1 %v2733_v47, %s2466_s18  ;;  %v423_v27 = vor.u32 %v422_v14, %v419_v13  ;;  %v433_v30 = vor.u32 %v432_v17, %v428_v16  ;;  %v438_v36 = vrot.slane %v436_v5, 5  ;;  %v2158_v45 = vrot.slane %v2903_v46, 9 }
  0x56   : > { %v554_v21 = vrot.slane %v553_v24, 4  ;;  %v454_v10 = vshrl.u32 %v2980_v62, 16  ;;  %v2997_v24 = vld [vmem:[%s2516_s21 + $0x90] sm:$0xf] }
  0x57   : > { %v434_v35 = vrot.slane %v433_v30, 4  ;;  %v3014_v30 = vld [vmem:[%s2516_s21 + $0x5c] sm:$0x1] }
  0x58   : > { %1081 = vrot.lane.b32.xlu0 %v2823_v55, %s2463_s30  ;;  %v559_v9 = vsel %vm2596_vm5, %v554_v21, %v558_v26  ;;  %v561_v21 = vshrl.u32 %v2997_v24, 16  ;;  %v564_v26 = vshll.u32 %v2997_v24, 16 }
  0x59   : > { %1114 = vrot.lane.b32.xlu1 %v2821_v52, %s2461_s24  ;;  %v439_v37 = vsel %vm2596_vm5, %v434_v35, %v438_v36  ;;  %v3023_v36 = vld [vmem:[%s2516_s21 + $0x98] sm:$0x1] }
  0x5c   : > { %1209 = vrot.lane.b32.xlu0 %v2834_v22, %s2466_s18 }
  0x5d   : > { %1242 = vrot.lane.b32.xlu1 %v2764_v63, %s2467_s19 }
  0x60   : > { %1116 = vrot.lane.b32.xlu0 %v2842_v18, %s2461_s24 }
  0x61   : > { %1149 = vrot.lane.b32.xlu1 %v2786_v3, %s2465_s11 }
  0x64   : > { %1244 = vrot.lane.b32.xlu0 %v2853_v29, %s2467_s19 }
  0x65   : > { %1277 = vrot.lane.b32.xlu1 %v2804_v39, %s2468_s20 }
  0x68   : > { %991 = vrot.lane.b32.xlu0 %v2764_v63, %s2464_s4  ;;  %v780_v63 = vsel %vm2548_vm4, %v2162_v50, %v779_v34  ;;  %v424_v34 = vrot.slane %v423_v27, 4  ;;  %v786_v50 = vrot.slane %v2888_v41, 5  ;;  %v789_v41 = vrot.slane %v250_v4, 5 }
  0x69   : > { %1151 = vrot.lane.b32.xlu1 %v2870_v59, %s2465_s11  ;;  %v2910_v49 = vcombine.low %v780_v63, %v783_v42 }
  0x6a   : > { %v429_v63 = vsel %vm2596_vm5, %v424_v34, %v428_v16  ;;  %v788_v42 = vrot.slane %v786_v50, 4  ;;  %v787_v40 = vsel %vm2548_vm4, %v2163_v38, %v786_v50  ;;  %v460_v34 = vshll.u32 %v3014_v30, 16 }
  0x6b   : > { %v2960_v43 = vcombine.low %v429_v63, %v439_v37  ;;  %v563_v50 = vrot.slane %v561_v21, 4  ;;  %v566_v38 = vrot.slane %v564_v26, 5  ;;  %v758_v21 = vrot.slane %v2980_v62, 5 }
  0x6c   : > { %1184 = vrot.lane.b32.xlu0 %v2823_v55, %s2462_s27  ;;  %v790_v44 = vsel %vm2548_vm4, %v788_v42, %v789_v41 }
  0x6d   : > { %1279 = vrot.lane.b32.xlu1 %v2882_v54, %s2468_s20 }
  0x70   : > { %993 = vrot.lane.b32.xlu0 %v2853_v29, %s2464_s4 }
  0x71   : > { %1071 = vrot.lane.b32.xlu1 %v2804_v39, %s2463_s30  ;;  %v543_v39 = vor.u32 %v542_v57, %v539_v51  ;;  %v2972_v51 = vcombine.low %v787_v40, %v790_v44  ;;  %v462_v44 = vrot.slane %v460_v34, 5 }
  0x73   : > { %v544_v19 = vrot.slane %v543_v39, 4  ;;  %v450_v39 = vshll.u32 %v2980_v62, 16 }
  0x74   : > { %1186 = vrot.lane.b32.xlu0 %v2910_v49, %s2462_s27 }
  0x75   : > { %1219 = vrot.lane.b32.xlu1 %v2842_v18, %s2466_s18  ;;  %v549_v32 = vsel %vm2596_vm5, %v544_v19, %v548_v58  ;;  %v2975_v58 = vld [vmem:[%s2516_s21 + $0x54] sm:$0xf]  ;;  %v456_v19 = vrot.slane %v454_v10, 4 }
  0x76   : > { %v2947_v25 = vcombine.low %v549_v32, %v559_v9  ;;  %v441_v46 = vshrl.u32 %v2975_v58, 16  ;;  %v444_v4 = vshll.u32 %v2975_v58, 16  ;;  %v3029_v42 = vcombine.low %v2975_v58, %v2980_v62 }
  0x77   : > { %v2159_v20 = vrot.slane %v2975_v58, 9  ;;  %v760_v62 = vrot.slane %v758_v21, 4 }
  0x78   : > { %1073 = vrot.lane.b32.xlu0 %v2882_v54, %s2463_s30  ;;  %v443_v16 = vrot.slane %v441_v46, 4  ;;  %v446_v17 = vrot.slane %v444_v4, 5 }
  0x79   : > { %1106 = vrot.lane.b32.xlu1 %v2834_v22, %s2461_s24 }
  0x7a   : > { %v447_v32 = vor.u32 %v446_v17, %v443_v16 }
  0x7c   : > { %1221 = vrot.lane.b32.xlu0 %v2928_v8, %s2466_s18 }
  0x7d   : > { %1254 = vrot.lane.b32.xlu1 %v2870_v59, %s2467_s19 }
  0x80   : > { %1108 = vrot.lane.b32.xlu0 %v2936_v31, %s2461_s24 }
  0x81   : > { %1141 = vrot.lane.b32.xlu1 %v2853_v29, %s2465_s11  ;;  %v751_v29 = vrot.slane %v2906_v48, 5  ;;  %v754_v48 = vrot.slane %v235_v2, 5  ;;  %v452_v2 = vrot.slane %v450_v39, 5 }
  0x83   : > { %v753_v57 = vrot.slane %v751_v29, 4  ;;  %v457_v9 = vor.u32 %v456_v19, %v452_v2 }
  0x84   : > { %1256 = vrot.lane.b32.xlu0 %v2947_v25, %s2467_s19 }
  0x85   : > { %1289 = vrot.lane.b32.xlu1 %v2910_v49, %s2468_s20  ;;  %v755_v7 = vsel %vm2548_vm4, %v753_v57, %v754_v48  ;;  %v458_v40 = vrot.slane %v457_v9, 4  ;;  %v567_v48 = vor.u32 %v566_v38, %v563_v50 }
  0x87   : > { %v2982_v0 = vpop.permute.xlu1 %1100  ;;  %v463_v4 = vsel %vm2596_vm5, %v458_v40, %v462_v44  ;;  %v568_v17 = vrot.slane %v567_v48, 4 }
  0x88   : > { %1003 = vrot.lane.b32.xlu0 %v2870_v59, %s2464_s4  ;;  %v2977_v60 = vpop.permute.xlu0 %1098  ;;  %v752_v59 = vsel %vm2548_vm4, %v2158_v45, %v751_v29  ;;  %v448_v29 = vrot.slane %v447_v32, 4  ;;  %v580_v45 = vshll.u32 %v3023_v36, 16  ;;  %v761_v32 = vrot.slane %v3014_v30, 5 }
  0x89   : > { %1143 = vrot.lane.b32.xlu1 %v2960_v43, %s2465_s11  ;;  %v3006_v13 = vcombine.low %v752_v59, %v755_v7 }
  0x8a   : > { %v453_v7 = vsel %vm2596_vm5, %v448_v29, %v452_v2  ;;  %v582_v10 = vrot.slane %v580_v45, 5  ;;  %v762_v50 = vsel %vm2548_vm4, %v760_v62, %v761_v32  ;;  %v3098_v45 = vld [vmem:[%s2516_s21 + $0x9c] sm:$0xf] }
  0x8b   : > { %v3057_v2 = vcombine.low %v453_v7, %v463_v4  ;;  %v585_v7 = vshrl.u32 %v3098_v45, 16  ;;  %v588_v4 = vshll.u32 %v3098_v45, 16 }
  0x8c   : > { %1176 = vrot.lane.b32.xlu0 %v2882_v54, %s2462_s27  ;;  %v3000_v54 = vld [vmem:[%s2516_s21 + $0x94] sm:$0xf] }
  0x8d   : > { %1291 = vrot.lane.b32.xlu1 %v2972_v51, %s2468_s20  ;;  %v574_v27 = vshrl.u32 %v3000_v54, 16  ;;  %v570_v5 = vshll.u32 %v3000_v54, 16  ;;  %v3040_v46 = vcombine.low %v2997_v24, %v3000_v54 }
  0x8e   : > { %v3004_v11 = vpop.permute.xlu0 %1168 }
  0x8f   : > { %v572_v63 = vrot.slane %v570_v5, 5  ;;  %v576_v37 = vrot.slane %v574_v27, 4 }
  0x90   : > { %1005 = vrot.lane.b32.xlu0 %v2947_v25, %s2464_s4 }
  0x91   : > { %1083 = vrot.lane.b32.xlu1 %v2910_v49, %s2463_s30  ;;  %v1064_v14 = vpop.permute.xlu1 %1063  ;;  %v577_v59 = vor.u32 %v576_v37, %v572_v63 }
  0x93   : > { %v578_v19 = vrot.slane %v577_v59, 4 }
  0x94   : > { %1178 = vrot.lane.b32.xlu0 %v3006_v13, %s2462_s27 }
  0x95   : > { %1211 = vrot.lane.b32.xlu1 %v2936_v31, %s2466_s18  ;;  %v1066_v49 = vpop.permute.xlu1 %1065 }
  0x96   : > { %v984_v35 = vpop.permute.xlu0 %983 }
  0x97   : > { %v1308_v39 = vsel %vm1305_vm6, %v2170_v61, %v984_v35  ;;  %v573_v61 = vsel %vm2596_vm5, %v568_v17, %v572_v63  ;;  %v793_v35 = vrot.slane %v3000_v54, 5  ;;  %v796_v54 = vrot.slane %v3023_v36, 5 }
  0x98   : > { %1085 = vrot.lane.b32.xlu0 %v2972_v51, %s2463_s30  ;;  %v1356_v5 = vsel %vm1354_vm7, %v1308_v39, %v1064_v14 }
  0x99   : > { %1118 = vrot.lane.b32.xlu1 %v2928_v8, %s2461_s24  ;;  %v3033_v41 = vpop.permute.xlu1 %1170  ;;  %v1389_v34 = vsel %vm1387_vm8, %v1356_v5, %v2977_v60  ;;  %v759_v60 = vsel %vm2548_vm4, %v2159_v20, %v758_v21  ;;  %v795_v44 = vrot.slane %v793_v35, 4  ;;  %v590_v5 = vrot.slane %v588_v4, 5 }
  0x9a   : > { %v986_v57 = vpop.permute.xlu0 %985  ;;  %v3095_v40 = vcombine.low %v759_v60, %v762_v50 }
  0x9b   : > { %v1311_v27 = vsel %vm1305_vm6, %v2541_v12, %v986_v57  ;;  %v583_v12 = vsel %vm2596_vm5, %v578_v19, %v582_v10  ;;  %v3102_v57 = vld [vmem:[%s2516_s21 + $0xa0] sm:$0xf] }
  0x9c   : > { %1213 = vrot.lane.b32.xlu0 %v3029_v42, %s2466_s18  ;;  %v1358_v9 = vsel %vm1354_vm7, %v1311_v27, %v1066_v49  ;;  %v3076_v58 = vcombine.low %v573_v61, %v583_v12  ;;  %v594_v39 = vshll.u32 %v3102_v57, 16  ;;  %v587_v27 = vrot.slane %v585_v7, 4  ;;  %v256_v12 = vld [vmem:[%s2516_s21 + $0xa4] sm:$0x1] }
  0x9d   : > { %1246 = vrot.lane.b32.xlu1 %v2960_v43, %s2467_s19  ;;  %v1391_v30 = vsel %vm1387_vm8, %v1358_v9, %v2982_v0  ;;  %v2164_v0 = vrot.slane %v2997_v24, 9 }
  0x9e   : > { %v1134_v16 = vpop.permute.xlu0 %1133  ;;  %v596_v20 = vrot.slane %v594_v39, 5  ;;  %v591_v32 = vor.u32 %v590_v5, %v587_v27  ;;  %v3197_v39 = vld [vmem:[%s2516_s21 + $0xac] sm:$0xf] }
  0x9f   : > { %v1136_v26 = vpop.permute.xlu1 %1135  ;;  %v794_v59 = vsel %vm2548_vm4, %v2164_v0, %v793_v35  ;;  %v618_v27 = vshll.u32 %v3197_v39, 16 }
  0xa0   : > { %1120 = vrot.lane.b32.xlu0 %v3040_v46, %s2461_s24  ;;  %v1424_v37 = vsel %vm1420_vm9, %v1391_v30, %v1136_v26  ;;  %v592_v35 = vrot.slane %v591_v32, 4 }
  0xa1   : > { %1153 = vrot.lane.b32.xlu1 %v2947_v25, %s2465_s11  ;;  %v1422_v25 = vsel %vm1420_vm9, %v1389_v34, %v1134_v16  ;;  %v1457_v48 = vsel %vm1453_vm10, %v1424_v37, %v3033_v41  ;;  %v797_v41 = vsel %vm2548_vm4, %v795_v44, %v796_v54  ;;  %v800_v54 = vrot.slane %v3102_v57, 5 }
  0xa2   : > { %v1204_v23 = vpop.permute.xlu0 %1203  ;;  %v1455_v63 = vsel %vm1453_vm10, %v1422_v25, %v3004_v11  ;;  %v2214_v26 = vcombine.low %v794_v59, %v797_v41  ;;  %v3194_v41 = vld [vmem:[%s2516_s21 + $0xa8] sm:$0xf] }
  0xa3   : > { %v1206_v14 = vpop.permute.xlu1 %1205  ;;  %v1488_v29 = vsel %vm1486_vm11, %v1455_v63, %v1204_v23 }
  0xa4   : > { %1248 = vrot.lane.b32.xlu0 %v3057_v2, %s2467_s19  ;;  %v1490_v10 = vsel %vm1486_vm11, %v1457_v48, %v1206_v14  ;;  %v604_v14 = vshll.u32 %v256_v12, 16 }
  0xa5   : > { %1281 = vrot.lane.b32.xlu1 %v3006_v13, %s2468_s20 }
  0xa6   : > { %v1239_v49 = vpop.permute.xlu0 %1238 }
  0xa7   : > { %v1241_v38 = vpop.permute.xlu1 %1240  ;;  %v1521_v11 = vsel %vm1519_vm12, %v1488_v29, %v1239_v49  ;;  %v606_v49 = vrot.slane %v604_v14, 5 }
  0xa8   : > { %995 = vrot.lane.b32.xlu0 %v2960_v43, %s2464_s4  ;;  %v1523_v16 = vsel %vm1519_vm12, %v1490_v10, %v1241_v38  ;;  %v597_v38 = vsel %vm2596_vm5, %v592_v35, %v596_v20 }
  0xa9   : > { %1155 = vrot.lane.b32.xlu1 %v3076_v58, %s2465_s11 }
  0xaa   : > { %v1274_v43 = vpop.permute.xlu0 %1273 }
  0xab   : > { %v3104_v24 = vpop.permute.xlu1 %987  ;;  %v1554_v36 = vsel %vm1552_vm13, %v1521_v11, %v1274_v43  ;;  %v2165_v11 = vrot.slane %v3098_v45, 9  ;;  %v802_v43 = vrot.slane %v800_v54, 4 }
  0xac   : > { %1188 = vrot.lane.b32.xlu0 %v2972_v51, %s2462_s27  ;;  %2293 = vmatprep.mubr.msk.bf16.mxu0 %vm1585_vm14, %v1554_v36  ;;  %v598_v51 = vshrl.u32 %v3102_v57, 16  ;;  %v803_v36 = vrot.slane %v256_v12, 5 }
  0xad   : > { %1283 = vrot.lane.b32.xlu1 %v3095_v40, %s2468_s20  ;;  %v801_v59 = vsel %vm2548_vm4, %v2165_v11, %v800_v54 }
  0xae   : > { %v1276_v17 = vpop.permute.xlu0 %1275  ;;  %v600_v23 = vrot.slane %v598_v51, 4 }
  0xaf   : > { %v3124_v19 = vpop.permute.xlu1 %989  ;;  %v1556_v21 = vsel %vm1552_vm13, %v1523_v16, %v1276_v17  ;;  %v609_v16 = vshrl.u32 %v3194_v41, 16  ;;  %v1314_v17 = vsel %vm1305_vm6, %v2531_v6, %v3104_v24 }
  0xb0   : > { %997 = vrot.lane.b32.xlu0 %v3057_v2, %s2464_s4  ;;  %2294 = vmatmul.mubr.msk.bf16.vlgmr.msra.gmra.mrb[0].mxu0 %vm1585_vm14, %v1556_v21  ;;  %v601_v9 = vor.u32 %v600_v23, %v596_v20  ;;  %v622_v21 = vshrl.u32 %v3197_v39, 16 }
  0xb1   : > { %1075 = vrot.lane.b32.xlu1 %v3006_v13, %s2463_s30  ;;  %v3144_v13 = vcombine.low %v3098_v45, %v3102_v57  ;;  %v611_v6 = vrot.slane %v609_v16, 4 }
  0xb2   : > { %v1068_v61 = vpop.permute.xlu0 %1067  ;;  %v602_v30 = vrot.slane %v601_v9, 4  ;;  %v624_v14 = vrot.slane %v622_v21, 4 }
  0xb3   : > { %v3133_v62 = vpop.permute.xlu1 %1069  ;;  %v1360_v5 = vsel %vm1354_vm7, %v1314_v17, %v1068_v61  ;;  %v620_v61 = vrot.slane %v618_v27, 5 }
  0xb4   : > { %1190 = vrot.lane.b32.xlu0 %v2214_v26, %s2462_s27  ;;  %v607_v63 = vsel %vm2596_vm5, %v602_v30, %v606_v49 }
  0xb5   : > { %1223 = vrot.lane.b32.xlu1 %v3040_v46, %s2466_s18  ;;  %v3163_v29 = vcombine.low %v597_v38, %v607_v63  ;;  %v1317_v63 = vsel %vm1305_vm6, %v2668_v53, %v3124_v19  ;;  %v3245_v53 = vld [vmem:[%s2516_s21 + $0xb8] sm:$0xf] }
  0xb6   : > { %v1103_v34 = vpop.permute.xlu0 %1102  ;;  %v1362_v11 = vsel %vm1354_vm7, %v1317_v63, %v3133_v62  ;;  %v3253_v62 = vcombine.low %v3194_v41, %v3197_v39 }
  0xb7   : > { %v3138_v25 = vpop.permute.xlu1 %1104  ;;  %v1393_v23 = vsel %vm1387_vm8, %v1360_v5, %v1103_v34  ;;  %v646_v5 = vshrl.u32 %v3245_v53, 16 }
  0xb8   : > { %1077 = vrot.lane.b32.xlu0 %v3095_v40, %s2463_s30 }
  0xb9   : > { %1110 = vrot.lane.b32.xlu1 %v3029_v42, %s2461_s24 }
  0xba   : > { %v1138_v60 = vpop.permute.xlu0 %1137 }
  0xbb   : > { %v3148_v50 = vpop.permute.xlu1 %999  ;;  %v1426_v32 = vsel %vm1420_vm9, %v1393_v23, %v1138_v60  ;;  %v642_v23 = vshll.u32 %v3245_v53, 16 }
  0xbc   : > { %1225 = vrot.lane.b32.xlu0 %v3144_v13, %s2466_s18 }
  0xbd   : > { %1258 = vrot.lane.b32.xlu1 %v3076_v58, %s2467_s19 }
  0xbe   : > { %v3158_v0 = vpop.permute.xlu0 %1139 }
  0xbf   : > { %v1173_v37 = vpop.permute.xlu1 %1172 }
  0xc0   : > { %1112 = vrot.lane.b32.xlu0 %v2866_v33, %s2461_s24  ;;  %v1459_v24 = vsel %vm1453_vm10, %v1426_v32, %v1173_v37  ;;  %v625_v37 = vor.u32 %v624_v14, %v620_v61  ;;  %v2166_v32 = vrot.slane %v3194_v41, 9 }
  0xc1   : > { %1145 = vrot.lane.b32.xlu1 %v3057_v2, %s2465_s11  ;;  %v804_v2 = vsel %vm2548_vm4, %v802_v43, %v803_v36  ;;  %v3238_v36 = vld [vmem:[%s2516_s21 + $0xb4] sm:$0xf] }
  0xc2   : > { %v3167_v44 = vpop.permute.xlu0 %1001  ;;  %v3183_v45 = vcombine.low %v801_v59, %v804_v2  ;;  %v1395_v59 = vsel %vm1387_vm8, %v1362_v11, %v3138_v25  ;;  %v626_v17 = vrot.slane %v625_v37, 4  ;;  %v636_v27 = vshll.u32 %v3238_v36, 16 }
  0xc3   : > { %v3170_v48 = vpop.permute.xlu1 %1079  ;;  %v1428_v19 = vsel %vm1420_vm9, %v1395_v59, %v3158_v0 }
  0xc4   : > { %1260 = vrot.lane.b32.xlu0 %v3163_v29, %s2467_s19 }
  0xc5   : > { %1293 = vrot.lane.b32.xlu1 %v2214_v26, %s2468_s20 }
  0xc6   : > { %v1175_v57 = vpop.permute.xlu0 %1174 }
  0xc7   : > { %v1208_v7 = vpop.permute.xlu1 %1207  ;;  %v1461_v16 = vsel %vm1453_vm10, %v1428_v19, %v1175_v57 }
  0xc8   : > { %1007 = vrot.lane.b32.xlu0 %v3076_v58, %s2464_s4  ;;  %v1492_v34 = vsel %vm1486_vm11, %v1459_v24, %v1208_v7 }
  0xc9   : > { %1147 = vrot.lane.b32.xlu1 %v2748_v1, %s2465_s11 }
  0xca   : > { %v3185_v4 = vpop.permute.xlu0 %1081 }
  0xcb   : > { %v3187_v10 = vpop.permute.xlu1 %1114 }
  0xcc   : > { %1180 = vrot.lane.b32.xlu0 %v3095_v40, %s2462_s27  ;;  %v612_v40 = vshll.u32 %v3194_v41, 16 }
  0xcd   : > { %1295 = vrot.lane.b32.xlu1 %v3183_v45, %s2468_s20 }
  0xce   : > { %v1210_v51 = vpop.permute.xlu0 %1209  ;;  %v614_v9 = vrot.slane %v612_v40, 5  ;;  %v633_v40 = vshrl.u32 %v3238_v36, 16 }
  0xcf   : > { %v1243_v58 = vpop.permute.xlu1 %1242  ;;  %v1494_v0 = vsel %vm1486_vm11, %v1461_v16, %v1210_v51  ;;  %v3308_v16 = vld [vmem:[%s2516_s21 + $0xc0] sm:$0xf] }
  0xd0   : > { %1009 = vrot.lane.b32.xlu0 %v3163_v29, %s2464_s4  ;;  %v1525_v30 = vsel %vm1519_vm12, %v1492_v34, %v1243_v58  ;;  %v615_v54 = vor.u32 %v614_v9, %v611_v6  ;;  %v807_v58 = vrot.slane %v3197_v39, 5  ;;  %v635_v34 = vrot.slane %v633_v40, 4 }
  0xd1   : > { %1087 = vrot.lane.b32.xlu1 %v2214_v26, %s2463_s30  ;;  %v259_v26 = vld [vmem:[%s2516_s21 + $0xb0] sm:$0x1] }
  0xd2   : > { %v3210_v20 = vpop.permute.xlu0 %1116  ;;  %v628_v38 = vshll.u32 %v259_v26, 16  ;;  %v616_v25 = vrot.slane %v615_v54, 4  ;;  %v809_v24 = vrot.slane %v807_v58, 4  ;;  %v810_v9 = vrot.slane %v259_v26, 5 }
  0xd3   : > { %v3213_v12 = vpop.permute.xlu1 %1149  ;;  %v808_v26 = vsel %vm2548_vm4, %v2166_v32, %v807_v58 }
  0xd4   : > { %1182 = vrot.lane.b32.xlu0 %v2779_v28, %s2462_s27  ;;  %v630_v7 = vrot.slane %v628_v38, 5  ;;  %v621_v51 = vsel %vm2596_vm5, %v616_v25, %v620_v61  ;;  %v811_v38 = vsel %vm2548_vm4, %v809_v24, %v810_v9  ;;  %v814_v25 = vrot.slane %v3245_v53, 5 }
  0xd5   : > { %1215 = vrot.lane.b32.xlu1 %v2866_v33, %s2466_s18 }
  0xd6   : > { %v1245_v35 = vpop.permute.xlu0 %1244  ;;  %v631_v6 = vsel %vm2596_vm5, %v626_v17, %v630_v7  ;;  %v3318_v17 = vld [vmem:[%s2516_s21 + $0xc4] sm:$0xf] }
  0xd7   : > { %v1278_v49 = vpop.permute.xlu1 %1277  ;;  %v1527_v39 = vsel %vm1519_vm12, %v1494_v0, %v1245_v35  ;;  %v638_v35 = vrot.slane %v636_v27, 5 }
  0xd8   : > { %v1558_v60 = vsel %vm1552_vm13, %v1525_v30, %v1278_v49  ;;  %1089 = vrot.lane.b32.xlu0 %v3183_v45, %s2463_s30  ;;  %v644_v30 = vrot.slane %v642_v23, 5  ;;  %v648_v49 = vrot.slane %v646_v5, 4  ;;  %v820_v5 = vshrl.u32 %v3308_v16, 16 }
  0xd9   : > { %1122 = vrot.lane.b32.xlu1 %v3144_v13, %s2461_s24  ;;  %2297 = vmatprep.mubr.msk.bf16.mxu0 %vm1585_vm14, %v1558_v60  ;;  %v262_v60 = vld [vmem:[%s2516_s21 + $0xbc] sm:$0x1]  ;;  %v639_v63 = vor.u32 %v638_v35, %v635_v34  ;;  %v2167_v23 = vrot.slane %v3238_v36, 9 }
  0xda   : > { %v3235_v43 = vpop.permute.xlu0 %991  ;;  %v649_v54 = vor.u32 %v648_v49, %v644_v30  ;;  %v652_v37 = vshll.u32 %v262_v60, 16  ;;  %v822_v35 = vrot.slane %v820_v5, 4 }
  0xdb   : > { %v3242_v2 = vpop.permute.xlu1 %1151  ;;  %v640_v59 = vrot.slane %v639_v63, 4 }
  0xdc   : > { %1217 = vrot.lane.b32.xlu0 %v2821_v52, %s2466_s18  ;;  %v650_v19 = vrot.slane %v649_v54, 4  ;;  %v654_v7 = vrot.slane %v652_v37, 5 }
  0xdd   : > { %1250 = vrot.lane.b32.xlu1 %v2748_v1, %s2467_s19  ;;  %v645_v0 = vsel %vm2596_vm5, %v640_v59, %v644_v30 }
  0xde   : > { %v3261_v21 = vpop.permute.xlu0 %1184 }
  0xdf   : > { %v1280_v57 = vpop.permute.xlu1 %1279 }
  0xe0   : > { %v1560_v1 = vsel %vm1552_vm13, %v1527_v39, %v1280_v57  ;;  %1124 = vrot.lane.b32.xlu0 %v3253_v62, %s2461_s24  ;;  %v823_v39 = vshll.u32 %v3308_v16, 16  ;;  %v829_v57 = vshll.u32 %v3318_v17, 16 }
  0xe1   : > { %1157 = vrot.lane.b32.xlu1 %v3163_v29, %s2465_s11  ;;  %2298 = vmatmul.mubr.msk.bf16.gmra.mrb[4].mxu0 %vm1585_vm14, %v1560_v1  ;;  %v3285_v29 = vcombine.low %v621_v51, %v631_v6  ;;  %v1332_v1 = vsel %vm1305_vm6, %v2866_v33, %v3148_v50  ;;  %v816_v51 = vrot.slane %v814_v25, 4  ;;  %v817_v6 = vrot.slane %v262_v60, 5 }
  0xe2   : > { %v3278_v14 = vpop.permute.xlu0 %993  ;;  %v825_v50 = vrot.slane %v823_v39, 5  ;;  %v831_v30 = vrot.slane %v829_v57, 5 }
  0xe3   : > { %v3280_v41 = vpop.permute.xlu1 %1071  ;;  %v818_v60 = vsel %vm2548_vm4, %v816_v51, %v817_v6 }
  0xe4   : > { %1252 = vrot.lane.b32.xlu0 %v2786_v3, %s2467_s19  ;;  %v826_v59 = vor.u32 %v825_v50, %v822_v35  ;;  %v2168_v50 = vrot.slane %v3308_v16, 9 }
  0xe5   : > { %1285 = vrot.lane.b32.xlu1 %v2779_v28, %s2468_s20  ;;  %v3299_v28 = vcombine.low %v808_v26, %v811_v38  ;;  %v265_v38 = vld [vmem:[%s2516_s21 + $0xc8] sm:$0x1] }
  0xe6   : > { %v3291_v61 = vpop.permute.xlu0 %1186 }
  0xe7   : > { %v1220_v11 = vpop.permute.xlu1 %1219 }
  0xe8   : > { %1159 = vrot.lane.b32.xlu0 %v3285_v29, %s2465_s11 }
  0xe9   : > { %1192 = vrot.lane.b32.xlu1 %v3183_v45, %s2462_s27  ;;  %v3314_v45 = vcombine.low %v3238_v36, %v3245_v53  ;;  %v833_v53 = vshrl.u32 %v3318_v17, 16  ;;  %v1372_v36 = vsel %vm1354_vm7, %v1332_v1, %v3170_v48 }
  0xea   : > { %v3301_v3 = vpop.permute.xlu0 %1073  ;;  %v1405_v9 = vsel %vm1387_vm8, %v1372_v36, %v3187_v10  ;;  %v815_v10 = vsel %vm2548_vm4, %v2167_v23, %v814_v25  ;;  %v3384_v23 = vld [vmem:[%s2516_s21 + $0xd0] sm:$0xf] }
  0xeb   : > { %v3303_v58 = vpop.permute.xlu1 %1106  ;;  %v1438_v33 = vsel %vm1420_vm9, %v1405_v9, %v3213_v12  ;;  %v835_v49 = vrot.slane %v833_v53, 4  ;;  %v3364_v37 = vcombine.low %v815_v10, %v818_v60  ;;  %v867_v51 = vshrl.u32 %v3384_v23, 16 }
  0xec   : > { %1287 = vrot.lane.b32.xlu0 %v2823_v55, %s2468_s20  ;;  %v655_v55 = vsel %vm2596_vm5, %v650_v19, %v654_v7  ;;  %v1471_v48 = vsel %vm1453_vm10, %v1438_v33, %v3261_v21  ;;  %v839_v7 = vshll.u32 %v265_v38, 16  ;;  %v863_v6 = vshll.u32 %v3384_v23, 16 }
  0xed   : > { %1194 = vrot.lane.b32.xlu1 %v3299_v28, %s2462_s27  ;;  %v3336_v32 = vcombine.low %v645_v0, %v655_v55  ;;  %v1504_v12 = vsel %vm1486_vm11, %v1471_v48, %v1220_v11  ;;  %v836_v19 = vor.u32 %v835_v49, %v831_v30  ;;  %v1335_v11 = vsel %vm1305_vm6, %v2821_v52, %v3167_v44  ;;  %v3377_v55 = vld [vmem:[%s2516_s21 + $0xcc] sm:$0xf] }
  0xee   : > { %v1222_v40 = vpop.permute.xlu0 %1221  ;;  %v1374_v25 = vsel %vm1354_vm7, %v1335_v11, %v3185_v4  ;;  %v827_v44 = vrot.slane %v826_v59, 4  ;;  %v841_v39 = vrot.slane %v839_v7, 5  ;;  %v857_v53 = vshll.u32 %v3377_v55, 16 }
  0xef   : > { %v1255_v27 = vpop.permute.xlu1 %1254  ;;  %v851_v60 = vrot.slane %v265_v38, 5 }
  0xf0   : > { %1227 = vrot.lane.b32.xlu0 %v3253_v62, %s2466_s18  ;;  %v1537_v63 = vsel %vm1519_vm12, %v1504_v12, %v1255_v27  ;;  %v1407_v27 = vsel %vm1387_vm8, %v1374_v25, %v3210_v20  ;;  %v854_v20 = vshrl.u32 %v3377_v55, 16  ;;  %v832_v35 = vsel %vm2596_vm5, %v827_v44, %v831_v30  ;;  %v268_v30 = vld [vmem:[%s2516_s21 + $0xd4] sm:$0x1]  ;;  %s2151_s21 = sshll.u32 %s3651_s12, 1 }
  0xf1   : > { %1229 = vrot.lane.b32.xlu1 %v3314_v45, %s2466_s18  ;;  %v1440_v52 = vsel %vm1420_vm9, %v1407_v27, %v3242_v2  ;;  %v848_v2 = vrot.slane %v3318_v17, 5  ;;  %v859_v48 = vrot.slane %v857_v53, 5  ;;  %v869_v12 = vrot.slane %v867_v51, 4 }
  0xf2   : > { %v3340_v24 = vpop.permute.xlu0 %1108  ;;  %v1473_v4 = vsel %vm1453_vm10, %v1440_v52, %v3291_v61  ;;  %v856_v49 = vrot.slane %v854_v20, 4  ;;  %v885_v51 = vrot.slane %v268_v30, 5 }
  0xf3   : > { %v3344_v34 = vpop.permute.xlu1 %1141  ;;  %v1506_v57 = vsel %vm1486_vm11, %v1473_v4, %v1222_v40  ;;  %v2218_v40 = vcombine.low %v3308_v16, %v3318_v17  ;;  %v865_v17 = vrot.slane %v863_v6, 5  ;;  %v849_v16 = vsel %vm2548_vm4, %v2168_v50, %v848_v2 }
  0xf4   : > { %1262 = vrot.lane.b32.xlu0 %v3285_v29, %s2467_s19 }
  0xf5   : > { %1264 = vrot.lane.b32.xlu1 %v3336_v32, %s2467_s19  ;;  %v870_v38 = vor.u32 %v869_v12, %v865_v17 }
  0xf6   : > { %v1257_v26 = vpop.permute.xlu0 %1256 }
  0xf7   : > { %v1290_v54 = vpop.permute.xlu1 %1289  ;;  %v1539_v61 = vsel %vm1519_vm12, %v1506_v57, %v1257_v26  ;;  %v871_v52 = vrot.slane %v870_v38, 4  ;;  %v2169_v57 = vrot.slane %v3377_v55, 9 }
  0xf8   : > { %1297 = vrot.lane.b32.xlu0 %v3299_v28, %s2468_s20  ;;  %v1570_v21 = vsel %vm1552_vm13, %v1537_v63, %v1290_v54  ;;  %v860_v54 = vor.u32 %v859_v48, %v856_v49 }
  0xf9   : > { %1011 = vrot.lane.b32.xlu1 %v3285_v29, %s2464_s4  ;;  %2309 = vmatprep.mubr.msk.bf16.mxu1 %vm1585_vm14, %v1570_v21  ;;  %v837_v29 = vrot.slane %v836_v19, 4  ;;  %v873_v19 = vshll.u32 %v268_v30, 16 }
  0xfa   : > { %v3374_v0 = vpop.permute.xlu0 %1003  ;;  %v861_v25 = vrot.slane %v860_v54, 4 }
  0xfb   : > { %v3381_v5 = vpop.permute.xlu1 %1143  ;;  %v842_v33 = vsel %vm2596_vm5, %v837_v29, %v841_v39  ;;  %v875_v44 = vrot.slane %v873_v19, 5  ;;  %v882_v29 = vrot.slane %v3384_v23, 5  ;;  %v2221_v39 = vcombine.low %v3377_v55, %v3384_v23 }
  0xfc   : > { %1299 = vrot.lane.b32.xlu0 %v3364_v37, %s2468_s20  ;;  %v2219_v63 = vcombine.low %v832_v35, %v842_v33 }
  0xfd   : > { %1013 = vrot.lane.b32.xlu1 %v3336_v32, %s2464_s4  ;;  %v876_v53 = vsel %vm2596_vm5, %v871_v52, %v875_v44  ;;  %v883_v56 = vsel %vm2548_vm4, %v2169_v57, %v882_v29 }
  0xfe   : > { %v3397_v1 = vpop.permute.xlu0 %1176 }
  0xff   : > { %v1292_v36 = vpop.permute.xlu1 %1291 }
 0x100   : > { %v1572_v9 = vsel %vm1552_vm13, %v1539_v61, %v1292_v36  ;;  %1091 = vrot.lane.b32.xlu0 %v3299_v28, %s2463_s30  ;;  %v850_v28 = vrot.slane %v848_v2, 4  ;;  %v884_v2 = vrot.slane %v882_v29, 4 }
 0x101   : > { %1093 = vrot.lane.b32.xlu1 %v3364_v37, %s2463_s30  ;;  %2310 = vmatmul.mubr.msk.bf16.vlgmr.msra.gmra.mrb[0].mxu1 %vm1585_vm14, %v1572_v9 }
 0x102   : > { %v3416_v10 = vpop.permute.xlu0 %1005  ;;  %v852_v59 = vsel %vm2548_vm4, %v850_v28, %v851_v60  ;;  %v886_v55 = vsel %vm2548_vm4, %v884_v2, %v885_v51 }
 0x103   : > { %v3418_v26 = vpop.permute.xlu1 %1083  ;;  %v2220_v7 = vcombine.low %v849_v16, %v852_v59 }
 0x104   : > { %1126 = vrot.lane.b32.xlu0 %v3314_v45, %s2461_s24 }
 0x105   : > { %1128 = vrot.lane.b32.xlu1 %v2218_v40, %s2461_s24  ;;  %s208_s24 = scalar_lea.vmem %s3641_s3, %s2151_s21 }
 0x106   : > { %v1179_v21 = vpop.permute.xlu0 %1178 }
 0x107   : > { %v1212_v11 = vpop.permute.xlu1 %1211 }
 0x108   : > { %1161 = vrot.lane.b32.xlu0 %v3336_v32, %s2465_s11  ;;  %v866_v32 = vsel %vm2596_vm5, %v861_v25, %v865_v17 }
 0x109   : > { %1163 = vrot.lane.b32.xlu1 %v2219_v63, %s2465_s11  ;;  %v2222_v23 = vcombine.low %v866_v32, %v876_v53 }
 0x10a   : > { %v3431_v27 = vpop.permute.xlu0 %1085 }
 0x10b   : > { %v1119_v4 = vpop.permute.xlu1 %1118 }
 0x10c   : > { %1196 = vrot.lane.b32.xlu0 %v3364_v37, %s2462_s27  ;;  %v1320_v37 = vsel %vm1305_vm6, %v2733_v47, %v3235_v43 }
 0x10d   : > { %1198 = vrot.lane.b32.xlu1 %v2220_v7, %s2462_s27  ;;  %v1364_v61 = vsel %vm1354_vm7, %v1320_v37, %v3280_v41  ;;  %v2223_v41 = vcombine.low %v883_v56, %v886_v55 }
 0x10e   : > { %v1214_v20 = vpop.permute.xlu0 %1213  ;;  %v1397_v9 = vsel %vm1387_vm8, %v1364_v61, %v3303_v58 }
 0x10f   : > { %v1247_v6 = vpop.permute.xlu1 %1246  ;;  %v1430_v47 = vsel %vm1420_vm9, %v1397_v9, %v3344_v34  ;;  %v1323_v34 = vsel %vm1305_vm6, %v2834_v22, %v3278_v14 }
 0x110   : > { %1231 = vrot.lane.b32.xlu0 %v2218_v40, %s2466_s18  ;;  %v1463_v43 = vsel %vm1453_vm10, %v1430_v47, %v3397_v1  ;;  %v1366_v1 = vsel %vm1354_vm7, %v1323_v34, %v3301_v3 }
 0x111   : > { %1233 = vrot.lane.b32.xlu1 %v2221_v39, %s2466_s18  ;;  %v1496_v35 = vsel %vm1486_vm11, %v1463_v43, %v1212_v11  ;;  %v1399_v48 = vsel %vm1387_vm8, %v1366_v1, %v3340_v24 }
 0x112   : > { %v1121_v36 = vpop.permute.xlu0 %1120  ;;  %v1529_v15 = vsel %vm1519_vm12, %v1496_v35, %v1247_v6  ;;  %v1432_v60 = vsel %vm1420_vm9, %v1399_v48, %v3381_v5 }
 0x113   : > { %v1154_v40 = vpop.permute.xlu1 %1153  ;;  %v1465_v17 = vsel %vm1453_vm10, %v1432_v60, %v1179_v21  ;;  %v1338_v21 = vsel %vm1305_vm6, %v2842_v18, %v3374_v0  ;;  %v1341_v18 = vsel %vm1305_vm6, %v2928_v8, %v3416_v10 }
 0x114   : > { %1266 = vrot.lane.b32.xlu0 %v2219_v63, %s2467_s19  ;;  %v1498_v12 = vsel %vm1486_vm11, %v1465_v17, %v1214_v20  ;;  %v1376_v11 = vsel %vm1354_vm7, %v1338_v21, %v3418_v26  ;;  %v1378_v0 = vsel %vm1354_vm7, %v1341_v18, %v3431_v27 }
 0x115   : > { %1268 = vrot.lane.b32.xlu1 %v2222_v23, %s2467_s19  ;;  %v1409_v25 = vsel %vm1387_vm8, %v1376_v11, %v1119_v4  ;;  %v1411_v4 = vsel %vm1387_vm8, %v1378_v0, %v1121_v36 }
 0x116   : > { %v1249_v33 = vpop.permute.xlu0 %1248  ;;  %v1442_v44 = vsel %vm1420_vm9, %v1409_v25, %v1154_v40 }
 0x117   : > { %v1282_v50 = vpop.permute.xlu1 %1281  ;;  %v1531_v14 = vsel %vm1519_vm12, %v1498_v12, %v1249_v33 }
 0x118   : > { %v1562_v58 = vsel %vm1552_vm13, %v1529_v15, %v1282_v50  ;;  %1301 = vrot.lane.b32.xlu0 %v2220_v7, %s2468_s20 }
 0x119   : > { %1303 = vrot.lane.b32.xlu1 %v2223_v41, %s2468_s20  ;;  %2301 = vmatprep.mubr.msk.bf16.mxu0 %vm1585_vm14, %v1562_v58 }
 0x11a   : > { %v996_v49 = vpop.permute.xlu0 %995 }
 0x11b   : > { %v1156_v28 = vpop.permute.xlu1 %1155  ;;  %v1326_v41 = vsel %vm1305_vm6, %v2936_v31, %v996_v49 }
 0x11c   : > { %v1444_v51 = vsel %vm1420_vm9, %v1411_v4, %v1156_v28 }
 0x11e   : > { %v1189_v22 = vpop.permute.xlu0 %1188 }
 0x11f   : > { %v1284_v30 = vpop.permute.xlu1 %1283  ;;  %v1475_v29 = vsel %vm1453_vm10, %v1442_v44, %v1189_v22 }
 0x120   : > { %v1564_v63 = vsel %vm1552_vm13, %v1531_v14, %v1284_v30 }
 0x121   : > { %2302 = vmatmul.mubr.msk.bf16.gmra.mrb[8].mxu0 %vm1585_vm14, %v1564_v63 }
 0x122   : > { %v998_v3 = vpop.permute.xlu0 %997 }
 0x123   : > { %v1076_v54 = vpop.permute.xlu1 %1075  ;;  %v1329_v17 = vsel %vm1305_vm6, %v3029_v42, %v998_v3 }
 0x124   : > { %v1368_v35 = vsel %vm1354_vm7, %v1326_v41, %v1076_v54 }
 0x126   : > { %v1191_v16 = vpop.permute.xlu0 %1190 }
 0x127   : > { %v1224_v24 = vpop.permute.xlu1 %1223  ;;  %v1477_v6 = vsel %vm1453_vm10, %v1444_v51, %v1191_v16 }
 0x128   : > { %v1508_v39 = vsel %vm1486_vm11, %v1475_v29, %v1224_v24 }
 0x12a   : > { %v1078_v59 = vpop.permute.xlu0 %1077 }
 0x12b   : > { %v1111_v38 = vpop.permute.xlu1 %1110  ;;  %v1370_v49 = vsel %vm1354_vm7, %v1329_v17, %v1078_v59 }
 0x12c   : > { %v1401_v15 = vsel %vm1387_vm8, %v1368_v35, %v1111_v38 }
 0x12e   : > { %v1226_v19 = vpop.permute.xlu0 %1225 }
 0x12f   : > { %v1259_v5 = vpop.permute.xlu1 %1258  ;;  %v1510_v37 = vsel %vm1486_vm11, %v1477_v6, %v1226_v19 }
 0x130   : > { %v1541_v20 = vsel %vm1519_vm12, %v1508_v39, %v1259_v5 }
 0x132   : > { %v1113_v7 = vpop.permute.xlu0 %1112 }
 0x133   : > { %v1146_v52 = vpop.permute.xlu1 %1145  ;;  %v1403_v12 = vsel %vm1387_vm8, %v1370_v49, %v1113_v7 }
 0x134   : > { %v1434_v58 = vsel %vm1420_vm9, %v1401_v15, %v1146_v52 }
 0x136   : > { %v1261_v32 = vpop.permute.xlu0 %1260 }
 0x137   : > { %v1294_v53 = vpop.permute.xlu1 %1293  ;;  %v1543_v61 = vsel %vm1519_vm12, %v1510_v37, %v1261_v32 }
 0x138   : > { %v1574_v57 = vsel %vm1552_vm13, %v1541_v20, %v1294_v53 }
 0x139   : > { %2313 = vmatprep.mubr.msk.bf16.mxu1 %vm1585_vm14, %v1574_v57 }
 0x13a   : > { %v1008_v26 = vpop.permute.xlu0 %1007 }
 0x13b   : > { %v1148_v2 = vpop.permute.xlu1 %1147  ;;  %v1344_v19 = vsel %vm1305_vm6, %v3040_v46, %v1008_v26 }
 0x13c   : > { %v1436_v14 = vsel %vm1420_vm9, %v1403_v12, %v1148_v2 }
 0x13e   : > { %v1181_v23 = vpop.permute.xlu0 %1180 }
 0x13f   : > { %v1296_v56 = vpop.permute.xlu1 %1295  ;;  %v1467_v34 = vsel %vm1453_vm10, %v1434_v58, %v1181_v23 }
 0x140   : > { %v1576_v8 = vsel %vm1552_vm13, %v1543_v61, %v1296_v56 }
 0x141   : > { %2314 = vmatmul.mubr.msk.bf16.gmra.mrb[4].mxu1 %vm1585_vm14, %v1576_v8 }
 0x142   : > { %v1010_v10 = vpop.permute.xlu0 %1009 }
 0x143   : > { %v1088_v27 = vpop.permute.xlu1 %1087  ;;  %v1347_v52 = vsel %vm1305_vm6, %v3144_v13, %v1010_v10 }
 0x144   : > { %v1380_v5 = vsel %vm1354_vm7, %v1344_v19, %v1088_v27 }
 0x146   : > { %v1183_v55 = vpop.permute.xlu0 %1182 }
 0x147   : > { %v1216_v9 = vpop.permute.xlu1 %1215  ;;  %v1469_v63 = vsel %vm1453_vm10, %v1436_v14, %v1183_v55 }
 0x148   : > { %v1500_v1 = vsel %vm1486_vm11, %v1467_v34, %v1216_v9 }
 0x14a   : > { %v1090_v36 = vpop.permute.xlu0 %1089 }
 0x14b   : > { %v1123_v40 = vpop.permute.xlu1 %1122  ;;  %v1382_v29 = vsel %vm1354_vm7, %v1347_v52, %v1090_v36 }
 0x14c   : > { %v1413_v21 = vsel %vm1387_vm8, %v1380_v5, %v1123_v40 }
 0x14e   : > { %v1218_v47 = vpop.permute.xlu0 %1217 }
 0x14f   : > { %v1251_v43 = vpop.permute.xlu1 %1250  ;;  %v1502_v54 = vsel %vm1486_vm11, %v1469_v63, %v1218_v47 }
 0x150   : > { %v1533_v28 = vsel %vm1519_vm12, %v1500_v1, %v1251_v43 }
 0x152   : > { %v1125_v33 = vpop.permute.xlu0 %1124 }
 0x153   : > { %v1158_v50 = vpop.permute.xlu1 %1157  ;;  %v1415_v32 = vsel %vm1387_vm8, %v1382_v29, %v1125_v33 }
 0x154   : > { %v1446_v7 = vsel %vm1420_vm9, %v1413_v21, %v1158_v50 }
 0x156   : > { %v1253_v48 = vpop.permute.xlu0 %1252 }
 0x157   : > { %v1286_v60 = vpop.permute.xlu1 %1285  ;;  %v1535_v16 = vsel %vm1519_vm12, %v1502_v54, %v1253_v48 }
 0x158   : > { %v1566_v31 = vsel %vm1552_vm13, %v1533_v28, %v1286_v60 }
 0x159   : > { %2305 = vmatprep.mubr.msk.bf16.mxu0 %vm1585_vm14, %v1566_v31 }
 0x15a   : > { %v1160_v22 = vpop.permute.xlu0 %1159 }
 0x15b   : > { %v1193_v30 = vpop.permute.xlu1 %1192  ;;  %v1448_v53 = vsel %vm1420_vm9, %v1415_v32, %v1160_v22 }
 0x15c   : > { %v1479_v44 = vsel %vm1453_vm10, %v1446_v7, %v1193_v30 }
 0x15e   : > { %v1288_v24 = vpop.permute.xlu0 %1287 }
 0x15f   : > { %v1195_v42 = vpop.permute.xlu1 %1194  ;;  %v1568_v3 = vsel %vm1552_vm13, %v1535_v16, %v1288_v24 }
 0x160   : > { %2306 = vmatmul.mubr.msk.bf16.gmra.mrb[12].mxu0 %vm1585_vm14, %v1568_v3  ;;  %v1481_v0 = vsel %vm1453_vm10, %v1448_v53, %v1195_v42 }
 0x162   : > { %v1228_v59 = vpop.permute.xlu0 %1227 }
 0x163   : > { %v1230_v38 = vpop.permute.xlu1 %1229  ;;  %v1512_v39 = vsel %vm1486_vm11, %v1479_v44, %v1228_v59 }
 0x164   : > { %v1514_v13 = vsel %vm1486_vm11, %v1481_v0, %v1230_v38 }
 0x166   : > { %v1263_v11 = vpop.permute.xlu0 %1262 }
 0x167   : > { %v1265_v25 = vpop.permute.xlu1 %1264  ;;  %v1545_v46 = vsel %vm1519_vm12, %v1512_v39, %v1263_v11 }
 0x168   : > { %v1547_v26 = vsel %vm1519_vm12, %v1514_v13, %v1265_v25 }
 0x16a   : > { %v1298_v20 = vpop.permute.xlu0 %1297 }
 0x16b   : > { %v1012_v57 = vpop.permute.xlu1 %1011  ;;  %v1578_v18 = vsel %vm1552_vm13, %v1545_v46, %v1298_v20 }
 0x16c   : > { %2317 = vmatprep.mubr.msk.bf16.mxu1 %vm1585_vm14, %v1578_v18  ;;  %v1350_v9 = vsel %vm1305_vm6, %v3253_v62, %v1012_v57 }
 0x16e   : > { %v1300_v4 = vpop.permute.xlu0 %1299 }
 0x16f   : > { %v1014_v2 = vpop.permute.xlu1 %1013  ;;  %v1580_v51 = vsel %vm1552_vm13, %v1547_v26, %v1300_v4 }
 0x170   : > { %2318 = vmatmul.mubr.msk.bf16.gmra.mrb[8].mxu1 %vm1585_vm14, %v1580_v51  ;;  %v1353_v47 = vsel %vm1305_vm6, %v3314_v45, %v1014_v2 }
 0x172   : > { %v1092_v6 = vpop.permute.xlu0 %1091 }
 0x173   : > { %v1094_v37 = vpop.permute.xlu1 %1093  ;;  %v1384_v43 = vsel %vm1354_vm7, %v1350_v9, %v1092_v6 }
 0x174   : > { %v1386_v35 = vsel %vm1354_vm7, %v1353_v47, %v1094_v37 }
 0x176   : > { %v1127_v23 = vpop.permute.xlu0 %1126 }
 0x177   : > { %v1129_v61 = vpop.permute.xlu1 %1128  ;;  %v1417_v33 = vsel %vm1387_vm8, %v1384_v43, %v1127_v23 }
 0x178   : > { %v1419_v50 = vsel %vm1387_vm8, %v1386_v35, %v1129_v61 }
 0x17a   : > { %v1162_v56 = vpop.permute.xlu0 %1161 }
 0x17b   : > { %v1164_v8 = vpop.permute.xlu1 %1163  ;;  %v1450_v58 = vsel %vm1420_vm9, %v1417_v33, %v1162_v56 }
 0x17c   : > { %v1452_v62 = vsel %vm1420_vm9, %v1419_v50, %v1164_v8 }
 0x17e   : > { %v1197_v10 = vpop.permute.xlu0 %1196 }
 0x17f   : > { %v1199_v27 = vpop.permute.xlu1 %1198  ;;  %v1483_v31 = vsel %vm1453_vm10, %v1450_v58, %v1197_v10 }
 0x180   : > { %v1485_v17 = vsel %vm1453_vm10, %v1452_v62, %v1199_v27 }
 0x182   : > { %v1232_v55 = vpop.permute.xlu0 %1231 }
 0x183   : > { %v1234_v36 = vpop.permute.xlu1 %1233  ;;  %v2295_v40 = vpop.f32.mrb[0].mxu0  ;;  %v1516_v49 = vsel %vm1486_vm11, %v1483_v31, %v1232_v55 }
 0x184   : > { %v1717_v41 = vpop.f32.mrb[1].mxu0  ;;  %v1883_v12 = vmul.f32 %v2295_v40, %v2295_v40  ;;  %v1518_v30 = vsel %vm1486_vm11, %v1485_v17, %v1234_v36 }
 0x185   : > { %v2296_v15 = vpop.f32.mrb[2].mxu0  ;;  %v1881_v48 = vmul.f32 %v1717_v41, %v1717_v41 }
 0x186   : > { %v1720_v34 = vpop.f32.mrb[3].mxu0  ;;  %v1267_v1 = vpop.permute.xlu0 %1266  ;;  %v1884_v63 = vmul.f32 %v2296_v15, %v2296_v15 }
 0x187   : > { %v1269_v28 = vpop.permute.xlu1 %1268  ;;  %v1844_v60 = vadd.f32 %v1720_v34, %v1717_v41  ;;  %v1882_v45 = vmul.f32 %v1720_v34, %v1720_v34  ;;  %v1549_v54 = vsel %vm1519_vm12, %v1516_v49, %v1267_v1 }
 0x188   : > { %v1551_v24 = vsel %vm1519_vm12, %v1518_v30, %v1269_v28 }
 0x189   : > { %v1845_v22 = vadd.f32 %v2295_v40, %v1844_v60  ;;  %v1913_v14 = vadd.f32 %v1882_v45, %v1881_v48 }
 0x18a   : > { %v1302_v16 = vpop.permute.xlu0 %1301 }
 0x18b   : > { %v1914_v42 = vadd.f32 %v1913_v14, %v1883_v12  ;;  %v1304_v3 = vpop.permute.xlu1 %1303  ;;  %v1582_v59 = vsel %vm1552_vm13, %v1549_v54, %v1302_v16  ;;  %v1846_v38 = vadd.f32 %v2296_v15, %v1845_v22 }
 0x18c   : > { %v1584_v19 = vsel %vm1552_vm13, %v1551_v24, %v1304_v3  ;;  %2321 = vmatprep.mubr.msk.bf16.mxu1 %vm1585_vm14, %v1582_v59 }
 0x18d   : > { %2322 = vmatmul.mubr.msk.bf16.gmra.mrb[12].mxu1 %vm1585_vm14, %v1584_v19  ;;  %v1915_v5 = vadd.f32 %v1914_v42, %v1884_v63 }
 0x1b4   : > { %v2299_v21 = vpop.f32.mrb[4].mxu0 }
 0x1b5   : > { %v1733_v11 = vpop.f32.mrb[5].mxu0  ;;  %v1887_v46 = vmul.f32 %v2299_v21, %v2299_v21 }
 0x1b6   : > { %v1847_v7 = vadd.f32 %v1846_v38, %v1733_v11  ;;  %v1885_v25 = vmul.f32 %v1733_v11, %v1733_v11  ;;  %v2300_v52 = vpop.f32.mrb[6].mxu0 }
 0x1b7   : > { %v1736_v44 = vpop.f32.mrb[7].mxu0  ;;  %v1888_v57 = vmul.f32 %v2300_v52, %v2300_v52 }
 0x1b8   : > { %v1916_v29 = vadd.f32 %v1915_v5, %v1885_v25  ;;  %v1848_v39 = vadd.f32 %v1847_v7, %v1736_v44  ;;  %v1886_v32 = vmul.f32 %v1736_v44, %v1736_v44 }
 0x1ba   : > { %v1849_v20 = vadd.f32 %v2299_v21, %v1848_v39  ;;  %v1917_v53 = vadd.f32 %v1916_v29, %v1886_v32 }
 0x1bc   : > { %v1918_v18 = vadd.f32 %v1917_v53, %v1887_v46  ;;  %v1850_v0 = vadd.f32 %v2300_v52, %v1849_v20 }
 0x1be   : > { %v1919_v13 = vadd.f32 %v1918_v18, %v1888_v57 }
 0x1d4   : > { %v2311_v26 = vpop.f32.mrb[0].mxu1 }
 0x1d5   : > { %v2378_v4 = vpack.i.bf16 %v2311_v26, %v2295_v40  ;;  %v1781_v2 = vpop.f32.mrb[1].mxu1 }
 0x1d6   : > { %v2374_v51 = vpack.i.bf16 %v1781_v2, %v1717_v41  ;;  %v3567_v6 = vpop.f32.mrb[2].mxu1  ;;  %v1897_v5 = vmul.f32 %v1781_v2, %v1781_v2 }
 0x1d7   : > { %v2380_v37 = vpack.i.bf16 %v3567_v6, %v2296_v15  ;;  %v1784_v23 = vpop.f32.mrb[3].mxu1  ;;  %v1900_v32 = vmul.f32 %v3567_v6, %v3567_v6 }
 0x1d8   : > { %v2376_v61 = vpack.i.bf16 %v1784_v23, %v1720_v34  ;;  %2375 = vxpose.xlu0.b32.start [1/16] (narrow) %v2374_v51, 8  ;;  %v1898_v7 = vmul.f32 %v1784_v23, %v1784_v23 }
 0x1dc   : > { %2377 = vxpose.xlu0.b32.cont [2/16] (narrow) %v2376_v61, 8 }
 0x1e0   : > { %2379 = vxpose.xlu0.b32.cont [3/16] (narrow) %v2378_v4, 8 }
 0x1e4   : > { %2381 = vxpose.xlu0.b32.cont [4/16] (narrow) %v2380_v37, 8 }
 0x1f4   : > { %v3570_v56 = vpop.f32.mrb[8].mxu0 }
 0x1f5   : > { %v3572_v8 = vpop.f32.mrb[9].mxu0  ;;  %v1891_v43 = vmul.f32 %v3570_v56, %v3570_v56 }
 0x1f6   : > { %v1851_v10 = vadd.f32 %v1850_v0, %v3572_v8  ;;  %v1889_v27 = vmul.f32 %v3572_v8, %v3572_v8  ;;  %v3577_v55 = vpop.f32.mrb[10].mxu0 }
 0x1f7   : > { %v3579_v9 = vpop.f32.mrb[11].mxu0  ;;  %v1892_v33 = vmul.f32 %v3577_v55, %v3577_v55 }
 0x1f8   : > { %v1920_v36 = vadd.f32 %v1919_v13, %v1889_v27  ;;  %v1852_v40 = vadd.f32 %v1851_v10, %v3579_v9  ;;  %v1890_v47 = vmul.f32 %v3579_v9, %v3579_v9 }
 0x1fa   : > { %v1853_v41 = vadd.f32 %v3570_v56, %v1852_v40  ;;  %v1921_v35 = vadd.f32 %v1920_v36, %v1890_v47 }
 0x1fc   : > { %v1922_v15 = vadd.f32 %v1921_v35, %v1891_v43  ;;  %v1854_v50 = vadd.f32 %v3577_v55, %v1853_v41 }
 0x1fe   : > { %v1923_v58 = vadd.f32 %v1922_v15, %v1892_v33 }
 0x214   : > { %v2315_v34 = vpop.f32.mrb[4].mxu1 }
 0x215   : > { %v2386_v1 = vpack.i.bf16 %v2315_v34, %v2299_v21  ;;  %v1797_v62 = vpop.f32.mrb[5].mxu1  ;;  %v1903_v36 = vmul.f32 %v2315_v34, %v2315_v34 }
 0x216   : > { %v2382_v48 = vpack.i.bf16 %v1797_v62, %v1733_v11  ;;  %v2316_v28 = vpop.f32.mrb[6].mxu1  ;;  %v1901_v0 = vmul.f32 %v1797_v62, %v1797_v62 }
 0x217   : > { %v2388_v60 = vpack.i.bf16 %v2316_v28, %v2300_v52  ;;  %v1800_v45 = vpop.f32.mrb[7].mxu1 }
 0x218   : > { %v2384_v17 = vpack.i.bf16 %v1800_v45, %v1736_v44  ;;  %2383 = vxpose.xlu0.b32.cont [5/16] (narrow) %v2382_v48, 8  ;;  %v1899_v44 = vmul.f32 %v2311_v26, %v2311_v26 }
 0x21c   : > { %2385 = vxpose.xlu0.b32.cont [6/16] (narrow) %v2384_v17, 8 }
 0x220   : > { %2387 = vxpose.xlu0.b32.cont [7/16] (narrow) %v2386_v1, 8 }
 0x224   : > { %2389 = vxpose.xlu0.b32.cont [8/16] (narrow) %v2388_v60, 8 }
 0x233   : > { %v3590_v31 = vpop.f32.mrb[12].mxu0 }
 0x234   : > { %v3592_v49 = vpop.f32.mrb[13].mxu0  ;;  %v1895_v24 = vmul.f32 %v3590_v31, %v3590_v31 }
 0x235   : > { %v1855_v12 = vadd.f32 %v1854_v50, %v3592_v49  ;;  %v1893_v22 = vmul.f32 %v3592_v49, %v3592_v49  ;;  %v3597_v14 = vpop.f32.mrb[14].mxu0 }
 0x236   : > { %v3599_v30 = vpop.f32.mrb[15].mxu0  ;;  %v1896_v59 = vmul.f32 %v3597_v14, %v3597_v14 }
 0x237   : > { %v1924_v63 = vadd.f32 %v1923_v58, %v1893_v22  ;;  %v1856_v54 = vadd.f32 %v1855_v12, %v3599_v30  ;;  %v1894_v16 = vmul.f32 %v3599_v30, %v3599_v30 }
 0x239   : > { %v1857_v42 = vadd.f32 %v3590_v31, %v1856_v54  ;;  %v1925_v3 = vadd.f32 %v1924_v63, %v1894_v16 }
 0x23b   : > { %v1858_v38 = vadd.f32 %v3597_v14, %v1857_v42  ;;  %v1926_v19 = vadd.f32 %v1925_v3, %v1895_v24 }
 0x23d   : > { %v1859_v21 = vadd.f32 %v1858_v38, %v1781_v2  ;;  %v1927_v11 = vadd.f32 %v1926_v19, %v1896_v59 }
 0x23f   : > { %v1860_v25 = vadd.f32 %v1859_v21, %v1784_v23  ;;  %v1928_v52 = vadd.f32 %v1927_v11, %v1897_v5  ;;  %v1902_v23 = vmul.f32 %v1800_v45, %v1800_v45 }
 0x241   : > { %v1861_v29 = vadd.f32 %v2311_v26, %v1860_v25  ;;  %v1929_v39 = vadd.f32 %v1928_v52, %v1898_v7 }
 0x243   : > { %v1930_v46 = vadd.f32 %v1929_v39, %v1899_v44  ;;  %v2319_v20 = vpop.f32.mrb[8].mxu1  ;;  %v1862_v53 = vadd.f32 %v3567_v6, %v1861_v29 }
 0x244   : > { %v2394_v57 = vpack.i.bf16 %v2319_v20, %v3570_v56  ;;  %v1813_v18 = vpop.f32.mrb[9].mxu1  ;;  %v1904_v56 = vmul.f32 %v2316_v28, %v2316_v28  ;;  %v1907_v50 = vmul.f32 %v2319_v20, %v2319_v20 }
 0x245   : > { %v1863_v13 = vadd.f32 %v1862_v53, %v1797_v62  ;;  %v1931_v4 = vadd.f32 %v1930_v46, %v1900_v32  ;;  %v2390_v2 = vpack.i.bf16 %v1813_v18, %v3572_v8  ;;  %v2320_v51 = vpop.f32.mrb[10].mxu1  ;;  %v1905_v8 = vmul.f32 %v1813_v18, %v1813_v18 }
 0x246   : > { %v2396_v37 = vpack.i.bf16 %v2320_v51, %v3577_v55  ;;  %v1816_v26 = vpop.f32.mrb[11].mxu1  ;;  %v1908_v62 = vmul.f32 %v2320_v51, %v2320_v51 }
 0x247   : > { %v1864_v61 = vadd.f32 %v1863_v13, %v1800_v45  ;;  %v1932_v10 = vadd.f32 %v1931_v4, %v1901_v0  ;;  %v2392_v27 = vpack.i.bf16 %v1816_v26, %v3579_v9  ;;  %2391 = vxpose.xlu0.b32.cont [9/16] (narrow) %v2390_v2, 8  ;;  %v1906_v55 = vmul.f32 %v1816_v26, %v1816_v26 }
 0x249   : > { %v1865_v6 = vadd.f32 %v2315_v34, %v1864_v61  ;;  %v1933_v40 = vadd.f32 %v1932_v10, %v1902_v23 }
 0x24b   : > { %v1866_v47 = vadd.f32 %v2316_v28, %v1865_v6  ;;  %v1934_v43 = vadd.f32 %v1933_v40, %v1903_v36  ;;  %2393 = vxpose.xlu0.b32.cont [10/16] (narrow) %v2392_v27, 8 }
 0x24d   : > { %v1935_v41 = vadd.f32 %v1934_v43, %v1904_v56  ;;  %v1867_v35 = vadd.f32 %v1866_v47, %v1813_v18 }
 0x24f   : > { %v1936_v33 = vadd.f32 %v1935_v41, %v1905_v8  ;;  %v1868_v15 = vadd.f32 %v1867_v35, %v1816_v26  ;;  %2395 = vxpose.xlu0.b32.cont [11/16] (narrow) %v2394_v57, 8 }
 0x251   : > { %v1869_v58 = vadd.f32 %v2319_v20, %v1868_v15  ;;  %v1937_v1 = vadd.f32 %v1936_v33, %v1906_v55 }
 0x253   : > { %v1938_v9 = vadd.f32 %v1937_v1, %v1907_v50  ;;  %2397 = vxpose.xlu0.b32.cont [12/16] (narrow) %v2396_v37, 8  ;;  %v1870_v48 = vadd.f32 %v2320_v51, %v1869_v58 }
 0x255   : > { %v1939_v34 = vadd.f32 %v1938_v9, %v1908_v62 }
 0x260   : > { %v2323_v60 = vpop.f32.mrb[12].mxu1 }
 0x261   : > { %v2402_v28 = vpack.i.bf16 %v2323_v60, %v3590_v31  ;;  %v1829_v45 = vpop.f32.mrb[13].mxu1  ;;  %v1911_v38 = vmul.f32 %v2323_v60, %v2323_v60 }
 0x262   : > { %v2398_v17 = vpack.i.bf16 %v1829_v45, %v3592_v49  ;;  %v1871_v12 = vadd.f32 %v1870_v48, %v1829_v45  ;;  %v1909_v22 = vmul.f32 %v1829_v45, %v1829_v45  ;;  %v2324_v63 = vpop.f32.mrb[14].mxu1 }
 0x263   : > { %v2404_v54 = vpack.i.bf16 %v2324_v63, %v3597_v14  ;;  %v1832_v16 = vpop.f32.mrb[15].mxu1  ;;  %v1912_v21 = vmul.f32 %v2324_v63, %v2324_v63 }
 0x264   : > { %v1940_v24 = vadd.f32 %v1939_v34, %v1909_v22  ;;  %v2400_v42 = vpack.i.bf16 %v1832_v16, %v3599_v30  ;;  %v1872_v3 = vadd.f32 %v1871_v12, %v1832_v16  ;;  %v1910_v59 = vmul.f32 %v1832_v16, %v1832_v16  ;;  %2399 = vxpose.xlu0.b32.cont [13/16] (narrow) %v2398_v17, 8 }
 0x266   : > { %v1873_v19 = vadd.f32 %v2323_v60, %v1872_v3  ;;  %v1941_v5 = vadd.f32 %v1940_v24, %v1910_v59 }
 0x268   : > { %v1874_v31 = vadd.f32 %v2324_v63, %v1873_v19  ;;  %v1942_v11 = vadd.f32 %v1941_v5, %v1911_v38  ;;  %2401 = vxpose.xlu0.b32.cont [14/16] (narrow) %v2400_v42, 8 }
 0x26a   : > { %v1875_v49 = vrot.slane %v1874_v31, 4  ;;  %v1943_v7 = vadd.f32 %v1942_v11, %v1912_v21 }
 0x26c   : > { %v1876_v25 = vadd.f32 %v1875_v49, %v1874_v31  ;;  %v1944_v52 = vrot.slane %v1943_v7, 4  ;;  %2403 = vxpose.xlu0.b32.cont [15/16] (narrow) %v2402_v28, 8 }
 0x26e   : > { %v1877_v14 = vrot.slane %v1876_v25, 2  ;;  %v1945_v44 = vadd.f32 %v1944_v52, %v1943_v7 }
 0x270   : > { %v1878_v30 = vadd.f32 %v1877_v14, %v1876_v25  ;;  %v1946_v29 = vrot.slane %v1945_v44, 2  ;;  %2405 = vxpose.xlu0.b32.end [16/16] (narrow) %v2404_v54, 8 }
 0x272   : > { %v1879_v39 = vrot.slane %v1878_v30, 1  ;;  %v1947_v32 = vadd.f32 %v1946_v29, %v1945_v44 }
 0x274   : > { %v1948_v46 = vrot.slane %v1947_v32, 1  ;;  %v1880_v20 = vadd.f32 %v1879_v39, %v1878_v30 }
 0x276   : > { %v1949_v53 = vadd.f32 %v1948_v46, %v1947_v32 }
 0x278   : > { %v1951_v57 = vsel %vm1950_vm15, %v1880_v20, %v1949_v53 }
 0x279   : > { %1952 = vst [vmem:[%s208_s24] sm:$0x3] %v1951_v57 }
 0x2b4   : > { %v2406_v18 = vpop.trf.xlu0 }
 0x2b5   : > { %v2410_v0 = vunpack.i.h.bf16 %v2406_v18  ;;  %v2407_v13 = vunpack.i.l.bf16 %v2406_v18 }
 0x2b7   : > { %v2252_v4 = vpack.c.bf16 %v2410_v0, %v2407_v13 }
 0x2b9   : > { %2025 = vst [vmem:[%s202_s28] sm:$0xff] %v2252_v4 }
 0x2ba PF: > { %s14_s14 = sadd.s32 1, %s2459_s14   ;;  %s3646_s12 = smov %s2455_s13 }
 0x2bb   : > { %p11_p5 = scmp.ge.s32.totalorder %s14_s14, 4   ;;  %s3647_s13 = smov %s3649_s15 }
 0x2bd   :  { %13 = sbr.rel (!%p11_p5) target bundleno = 2 (0x2), region = 71 }

</bundles_post_ra>
